<compile_context>
chip_gen: v5e
topology: v5e:2x2
jax: 0.10.0
libtpu: 0.0.40
codegen_flags: <defaults>
</compile_context>

<pallas_src>
import functools

import jax
import jax.numpy as jnp
from jax import lax
from jax.experimental import pallas as pl
from jax.experimental.pallas import tpu as pltpu

BN_EPS = 1e-5  # PyTorch BatchNorm2d default eps


# ----------------------------------------------------------------------------
# Fused ASPP kernel: one batch element per grid step, everything in VMEM.
# ----------------------------------------------------------------------------
def _aspp_kernel(x_ref,
                 wA_ref, bA_ref,
                 w31_ref, b31_ref, w32_ref, b32_ref, w33_ref, b33_ref,
                 wGP_ref, bGP_ref,
                 wF1_ref, bF1_ref,
                 wF2_ref, bF2_ref,
                 o_ref, *, H, W, dilation):
    """Shapes (per batch element):
      x_ref : (Cin, H*W)        o_ref : (Cd, H*W)
      wA    : (2*Cd, Cin)       w31/w32/w33/wF2 : (Cd, 9*Cd)  (tap-major im2col)
      wGP   : (Cd, Cd)          wF1   : (Cd, 5*Cd)
      b*    : (Cout, 1)         all weights/biases have BN folded in.
    """
    HW = H * W
    Cd = o_ref.shape[0]

    x = x_ref[...]                                                 # (Cin, HW)

    # conv1x1_1 (+BN) + ReLU  -> (2*Cd, HW) on the MXU
    y = jnp.dot(wA_ref[...], x, preferred_element_type=jnp.float32)
    y = jnp.maximum(y + bA_ref[...], 0.0)
    y1 = y[:Cd]                                                    # chunk dim=1
    y5 = y[Cd:]

    # lane-index helpers for the shifted-tap masks (computed once per step)
    pos = lax.broadcasted_iota(jnp.int32, (1, HW), 1)              # flat index
    col = pos % W                                                  # column idx

    def tap_meta(d):
        """For each of the 9 taps: flat shift k and f32 validity mask."""
        metas = []
        for ky in (-d, 0, d):
            for kx in (-d, 0, d):
                k = ky * W + kx
                valid = ((pos + k >= 0) & (pos + k < HW)
                         & (col + kx >= 0) & (col + kx < W))
                metas.append((k, valid.astype(jnp.float32)))
        return metas

    def conv3x3(inp, w_ref, b_ref, metas):
        # im2col: 9 lane-rolled + masked copies stacked on the sublane axis
        # (sublane blocks of Cd rows, 8-aligned), then one MXU matmul
        # (Cout, 9*C) x (9*C, HW).
        taps = []
        for k, valid in metas:
            if k == 0:
                taps.append(inp)
            else:
                r = pltpu.roll(inp, shift=(-k) % HW, axis=1)       # r[p]=inp[p+k]
                taps.append(r * valid)
        colm = jnp.concatenate(taps, axis=0)                       # (9*C, HW)
        out = jnp.dot(w_ref[...], colm, preferred_element_type=jnp.float32)
        return jnp.maximum(out + b_ref[...], 0.0)

    metas_d = tap_meta(dilation)   # the three dilated 3x3 convs share masks
    metas_1 = tap_meta(1)          # fuse 3x3 conv (dilation=1, padding=1)

    y2 = conv3x3(y1, w31_ref, b31_ref, metas_d)
    y3 = conv3x3(y2, w32_ref, b32_ref, metas_d)
    y4 = conv3x3(y3, w33_ref, b33_ref, metas_d)

    # Global-average-pool branch: mean over HW (XLU cross-lane reduce),
    # 1x1 conv (+BN) + ReLU, then resize 1x1 -> HxW (exact lane broadcast).
    y5m = jnp.mean(y5, axis=1, keepdims=True)                      # (Cd, 1)
    y5m_b = jnp.broadcast_to(y5m, (Cd, HW))                        # lane bcast
    y0 = jnp.dot(wGP_ref[...], y5m_b, preferred_element_type=jnp.float32)
    y0 = jnp.maximum(y0 + bGP_ref[...], 0.0)

    # fuse: cat -> 1x1 ConvBNReLU -> 3x3 ConvBNReLU (dil=1, pad=1)
    cat = jnp.concatenate([y0, y1, y2, y3, y4], axis=0)            # (5*Cd, HW)
    f = jnp.dot(wF1_ref[...], cat, preferred_element_type=jnp.float32)
    f = jnp.maximum(f + bF1_ref[...], 0.0)

    o_ref[...] = conv3x3(f, wF2_ref, bF2_ref, metas_1)


# ----------------------------------------------------------------------------
# Wrapper: fold BN into conv weight/bias, flatten spatial, launch one kernel.
# ----------------------------------------------------------------------------
def _fold_bn(w, gamma, beta, mean, var):
    scale = gamma / jnp.sqrt(var + BN_EPS)
    w_eff = w * scale[:, None, None, None]
    b_eff = beta - mean * scale
    return w_eff, b_eff


def _fold_1x1(p):
    w, b = _fold_bn(*p)
    return (w.reshape(w.shape[0], w.shape[1]).astype(jnp.float32),
            b.reshape(-1, 1).astype(jnp.float32))


def _fold_3x3(p):
    w, b = _fold_bn(*p)
    cout, cin = w.shape[0], w.shape[1]
    # tap-major layout to match the kernel's im2col row ordering: (ky,kx,cin)
    w2 = w.transpose(0, 2, 3, 1).reshape(cout, 9 * cin)
    return w2.astype(jnp.float32), b.reshape(-1, 1).astype(jnp.float32)


def simple_aspp(x, params, dilation=3):
    """x: (B, Cin, H, W) float32. params: dict of raw ConvBNReLU params."""
    B, Cin, H, W = x.shape
    HW = H * W

    wA, bA = _fold_1x1(params['conv1x1_1'])
    w31, b31 = _fold_3x3(params['conv3x3_1'])
    w32, b32 = _fold_3x3(params['conv3x3_2'])
    w33, b33 = _fold_3x3(params['conv3x3_3'])
    wGP, bGP = _fold_1x1(params['conv1x1_2'])
    wF1, bF1 = _fold_1x1(params['fuse_1x1'])
    wF2, bF2 = _fold_3x3(params['fuse_3x3'])

    Cd = wGP.shape[0]
    x2 = x.reshape(B, Cin, HW).astype(jnp.float32)   # pure glue reshape

    param_arrays = [wA, bA, w31, b31, w32, b32, w33, b33,
                    wGP, bGP, wF1, bF1, wF2, bF2]
    # Parameters are small; full-extent blocks, same block for every grid step.
    param_specs = [pl.BlockSpec(p.shape, lambda b: (0, 0)) for p in param_arrays]

    kernel = functools.partial(_aspp_kernel, H=H, W=W, dilation=dilation)

    out = pl.pallas_call(
        kernel,
        grid=(B,),
        in_specs=[pl.BlockSpec((None, Cin, HW), lambda b: (b, 0, 0))] + param_specs,
        out_specs=pl.BlockSpec((None, Cd, HW), lambda b: (b, 0, 0)),
        out_shape=jax.ShapeDtypeStruct((B, Cd, HW), jnp.float32),
        compiler_params=pltpu.CompilerParams(
            dimension_semantics=("parallel",)),
    )(x2, *param_arrays)

    return out.reshape(B, Cd, H, W)


# ----------------------------------------------------------------------------
# Pure-JAX reference (mirrors the PyTorch SimpleASPP forward) for verification.
# ----------------------------------------------------------------------------
def _conv_bn_relu_ref(x, w, gamma, beta, mean, var, *, padding=0, dilation=1):
    dn = ('NCHW', 'OIHW', 'NCHW')
    y = lax.conv_general_dilated(
        x, w, window_strides=(1, 1),
        padding=[(padding, padding), (padding, padding)],
        rhs_dilation=(dilation, dilation),
        dimension_numbers=dn)
    scale = gamma / jnp.sqrt(var + BN_EPS)
    y = y * scale[None, :, None, None] + (beta - mean * scale)[None, :, None, None]
    return jnp.maximum(y, 0.0)


def simple_aspp_reference(x, params, dilation=3):
    B, _, H, W = x.shape
    y = _conv_bn_relu_ref(x, *params['conv1x1_1'])
    Cd = y.shape[1] // 2
    y1, y5 = y[:, :Cd], y[:, Cd:]
    y2 = _conv_bn_relu_ref(y1, *params['conv3x3_1'], padding=dilation, dilation=dilation)
    y3 = _conv_bn_relu_ref(y2, *params['conv3x3_2'], padding=dilation, dilation=dilation)
    y4 = _conv_bn_relu_ref(y3, *params['conv3x3_3'], padding=dilation, dilation=dilation)
    y0 = jnp.mean(y5, axis=(2, 3), keepdims=True)
    y0 = _conv_bn_relu_ref(y0, *params['conv1x1_2'])
    y0 = jnp.broadcast_to(y0, (B, Cd, H, W))          # resize_to(1x1 -> HxW)
    cat = jnp.concatenate([y0, y1, y2, y3, y4], axis=1)
    f = _conv_bn_relu_ref(cat, *params['fuse_1x1'])
    return _conv_bn_relu_ref(f, *params['fuse_3x3'], padding=1, dilation=1)


if __name__ == "__main__":
    key = jax.random.PRNGKey(0)
    B, in_dim, out_dim, H, W = 2, 4, 8, 16, 16
    dilation = 3

    def make_cbr(k, cin, cout, ksize):
        kw, kg, kb, km, kv = jax.random.split(k, 5)
        w = jax.random.normal(kw, (cout, cin, ksize, ksize), jnp.float32)
        w = w * (0.5 / (cin * ksize * ksize) ** 0.5)
        gamma = 1.0 + 0.1 * jax.random.normal(kg, (cout,), jnp.float32)
        beta = 0.1 * jax.random.normal(kb, (cout,), jnp.float32)
        mean = 0.1 * jax.random.normal(km, (cout,), jnp.float32)
        var = jax.random.uniform(kv, (cout,), jnp.float32, minval=0.5, maxval=1.5)
        return (w, gamma, beta, mean, var)

    keys = jax.random.split(key, 8)
    x = jax.random.normal(keys[0], (B, in_dim, H, W), jnp.float32)
    params = {
        'conv1x1_1': make_cbr(keys[1], in_dim, 2 * out_dim, 1),
        'conv1x1_2': make_cbr(keys[2], out_dim, out_dim, 1),
        'conv3x3_1': make_cbr(keys[3], out_dim, out_dim, 3),
        'conv3x3_2': make_cbr(keys[4], out_dim, out_dim, 3),
        'conv3x3_3': make_cbr(keys[5], out_dim, out_dim, 3),
        'fuse_1x1':  make_cbr(keys[6], 5 * out_dim, out_dim, 1),
        'fuse_3x3':  make_cbr(keys[7], out_dim, out_dim, 3),
    }

    out = simple_aspp(x, params, dilation=dilation)
    out = jax.block_until_ready(out)

    ref = simple_aspp_reference(x, params, dilation=dilation)
    assert out.shape == ref.shape == (B, out_dim, H, W)
    err = float(jnp.max(jnp.abs(out - ref)))
    assert jnp.allclose(out, ref, rtol=1e-3, atol=1e-3), f"max abs err = {err}"
    print("KERNEL_OK")
</pallas_src>

<mosaic_0001>
module attributes {stable_mosaic.version = 11 : i64} {
  func.func @_aspp_kernel(%arg0: i32, %arg1: memref<1x4x256xf32, #tpu.memory_space<vmem>>, %arg2: memref<16x4xf32, #tpu.memory_space<vmem>>, %arg3: memref<16x1xf32, #tpu.memory_space<vmem>>, %arg4: memref<8x72xf32, #tpu.memory_space<vmem>>, %arg5: memref<8x1xf32, #tpu.memory_space<vmem>>, %arg6: memref<8x72xf32, #tpu.memory_space<vmem>>, %arg7: memref<8x1xf32, #tpu.memory_space<vmem>>, %arg8: memref<8x72xf32, #tpu.memory_space<vmem>>, %arg9: memref<8x1xf32, #tpu.memory_space<vmem>>, %arg10: memref<8x8xf32, #tpu.memory_space<vmem>>, %arg11: memref<8x1xf32, #tpu.memory_space<vmem>>, %arg12: memref<8x40xf32, #tpu.memory_space<vmem>>, %arg13: memref<8x1xf32, #tpu.memory_space<vmem>>, %arg14: memref<8x72xf32, #tpu.memory_space<vmem>>, %arg15: memref<8x1xf32, #tpu.memory_space<vmem>>, %arg16: memref<1x8x256xf32, #tpu.memory_space<vmem>>) attributes {dimension_semantics = [#tpu.dimension_semantics<parallel>], iteration_bounds = array<i64: 2>, scalar_prefetch = 0 : i64, scratch_operands = 0 : i64, tpu.core_type = #tpu.core_type<tc>, window_params = [{transform_indices = @transform_0, window_bounds = array<i64: 1, 4, 256>}, {pipeline_mode = #tpu.pipeline_mode<synchronous>, transform_indices = @transform_1, window_bounds = array<i64: 16, 4>}, {pipeline_mode = #tpu.pipeline_mode<synchronous>, transform_indices = @transform_2, window_bounds = array<i64: 16, 1>}, {pipeline_mode = #tpu.pipeline_mode<synchronous>, transform_indices = @transform_3, window_bounds = array<i64: 8, 72>}, {pipeline_mode = #tpu.pipeline_mode<synchronous>, transform_indices = @transform_4, window_bounds = array<i64: 8, 1>}, {pipeline_mode = #tpu.pipeline_mode<synchronous>, transform_indices = @transform_5, window_bounds = array<i64: 8, 72>}, {pipeline_mode = #tpu.pipeline_mode<synchronous>, transform_indices = @transform_6, window_bounds = array<i64: 8, 1>}, {pipeline_mode = #tpu.pipeline_mode<synchronous>, transform_indices = @transform_7, window_bounds = array<i64: 8, 72>}, {pipeline_mode = #tpu.pipeline_mode<synchronous>, transform_indices = @transform_8, window_bounds = array<i64: 8, 1>}, {pipeline_mode = #tpu.pipeline_mode<synchronous>, transform_indices = @transform_9, window_bounds = array<i64: 8, 8>}, {pipeline_mode = #tpu.pipeline_mode<synchronous>, transform_indices = @transform_10, window_bounds = array<i64: 8, 1>}, {pipeline_mode = #tpu.pipeline_mode<synchronous>, transform_indices = @transform_11, window_bounds = array<i64: 8, 40>}, {pipeline_mode = #tpu.pipeline_mode<synchronous>, transform_indices = @transform_12, window_bounds = array<i64: 8, 1>}, {pipeline_mode = #tpu.pipeline_mode<synchronous>, transform_indices = @transform_13, window_bounds = array<i64: 8, 72>}, {pipeline_mode = #tpu.pipeline_mode<synchronous>, transform_indices = @transform_14, window_bounds = array<i64: 8, 1>}, {transform_indices = @transform_15, window_bounds = array<i64: 1, 8, 256>}]} {
    %c0 = arith.constant 0 : index
    %c0_0 = arith.constant 0 : index
    %c0_1 = arith.constant 0 : index
    %0 = vector.load %arg1[%c0, %c0_0, %c0_1] : memref<1x4x256xf32, #tpu.memory_space<vmem>>, vector<1x4x256xf32>
    %1 = vector.shape_cast %0 : vector<1x4x256xf32> to vector<4x256xf32>
    %c0_2 = arith.constant 0 : index
    %c0_3 = arith.constant 0 : index
    %2 = vector.load %arg2[%c0_2, %c0_3] : memref<16x4xf32, #tpu.memory_space<vmem>>, vector<16x4xf32>
    %cst = arith.constant dense<0.000000e+00> : vector<16x256xf32>
    %3 = tpu.matmul %2, %1, %cst {dimension_numbers = #tpu.dot_dimension_numbers<[1], [0], [0], [1], [0, 0, 1, 1], [], []>} : vector<16x4xf32>, vector<4x256xf32>, vector<16x256xf32> -> vector<16x256xf32>
    %c0_4 = arith.constant 0 : index
    %c0_5 = arith.constant 0 : index
    %4 = vector.load %arg3[%c0_4, %c0_5] : memref<16x1xf32, #tpu.memory_space<vmem>>, vector<16x1xf32>
    %5 = vector.broadcast %4 : vector<16x1xf32> to vector<16x256xf32>
    %6 = arith.addf %3, %5 : vector<16x256xf32>
    %cst_6 = arith.constant 0.000000e+00 : f32
    %7 = vector.broadcast %cst_6 : f32 to vector<16x256xf32>
    %8 = arith.maximumf %6, %7 : vector<16x256xf32>
    %9 = vector.extract_strided_slice %8 {offsets = [0, 0], sizes = [8, 256], strides = [1, 1]} : vector<16x256xf32> to vector<8x256xf32>
    %10 = vector.extract_strided_slice %8 {offsets = [8, 0], sizes = [8, 256], strides = [1, 1]} : vector<16x256xf32> to vector<8x256xf32>
    %11 = tpu.iota {dimensions = array<i32: 1>} : vector<1x256xi32>
    %c16_i32 = arith.constant 16 : i32
    %c0_i32 = arith.constant 0 : i32
    %12 = arith.cmpi eq, %c16_i32, %c0_i32 : i32
    %c1_i32 = arith.constant 1 : i32
    %13 = arith.select %12, %c1_i32, %c16_i32 : i32
    %14 = vector.broadcast %13 : i32 to vector<1x256xi32>
    %15 = arith.remsi %11, %14 : vector<1x256xi32>
    %c0_i32_7 = arith.constant 0 : i32
    %16 = vector.broadcast %c0_i32_7 : i32 to vector<1x256xi32>
    %17 = arith.cmpi ne, %15, %16 : vector<1x256xi32>
    %c0_i32_8 = arith.constant 0 : i32
    %18 = vector.broadcast %c0_i32_8 : i32 to vector<1x256xi32>
    %19 = arith.cmpi slt, %15, %18 : vector<1x256xi32>
    %c0_i32_9 = arith.constant 0 : i32
    %20 = arith.cmpi slt, %13, %c0_i32_9 : i32
    %21 = vector.broadcast %20 : i1 to vector<1x256xi1>
    %22 = vector.broadcast %21 : vector<1x256xi1> to vector<1x256xi1>
    %23 = arith.xori %19, %22 : vector<1x256xi1>
    %24 = arith.andi %23, %17 : vector<1x256xi1>
    %25 = vector.broadcast %13 : i32 to vector<1x256xi32>
    %26 = arith.addi %15, %25 : vector<1x256xi32>
    %27 = arith.select %24, %26, %15 : vector<1x256xi1>, vector<1x256xi32>
    %c-51_i32 = arith.constant -51 : i32
    %28 = vector.broadcast %c-51_i32 : i32 to vector<1x256xi32>
    %29 = arith.addi %11, %28 : vector<1x256xi32>
    %c0_i32_10 = arith.constant 0 : i32
    %30 = vector.broadcast %c0_i32_10 : i32 to vector<1x256xi32>
    %31 = arith.cmpi sge, %29, %30 : vector<1x256xi32>
    %c-51_i32_11 = arith.constant -51 : i32
    %32 = vector.broadcast %c-51_i32_11 : i32 to vector<1x256xi32>
    %33 = arith.addi %11, %32 : vector<1x256xi32>
    %c256_i32 = arith.constant 256 : i32
    %34 = vector.broadcast %c256_i32 : i32 to vector<1x256xi32>
    %35 = arith.cmpi slt, %33, %34 : vector<1x256xi32>
    %36 = arith.andi %31, %35 : vector<1x256xi1>
    %c-3_i32 = arith.constant -3 : i32
    %37 = vector.broadcast %c-3_i32 : i32 to vector<1x256xi32>
    %38 = arith.addi %27, %37 : vector<1x256xi32>
    %c0_i32_12 = arith.constant 0 : i32
    %39 = vector.broadcast %c0_i32_12 : i32 to vector<1x256xi32>
    %40 = arith.cmpi sge, %38, %39 : vector<1x256xi32>
    %41 = arith.andi %36, %40 : vector<1x256xi1>
    %c-3_i32_13 = arith.constant -3 : i32
    %42 = vector.broadcast %c-3_i32_13 : i32 to vector<1x256xi32>
    %43 = arith.addi %27, %42 : vector<1x256xi32>
    %c16_i32_14 = arith.constant 16 : i32
    %44 = vector.broadcast %c16_i32_14 : i32 to vector<1x256xi32>
    %45 = arith.cmpi slt, %43, %44 : vector<1x256xi32>
    %46 = arith.andi %41, %45 : vector<1x256xi1>
    %47 = arith.extui %46 : vector<1x256xi1> to vector<1x256xi32>
    %48 = arith.sitofp %47 : vector<1x256xi32> to vector<1x256xf32>
    %c-48_i32 = arith.constant -48 : i32
    %49 = vector.broadcast %c-48_i32 : i32 to vector<1x256xi32>
    %50 = arith.addi %11, %49 : vector<1x256xi32>
    %c0_i32_15 = arith.constant 0 : i32
    %51 = vector.broadcast %c0_i32_15 : i32 to vector<1x256xi32>
    %52 = arith.cmpi sge, %50, %51 : vector<1x256xi32>
    %c-48_i32_16 = arith.constant -48 : i32
    %53 = vector.broadcast %c-48_i32_16 : i32 to vector<1x256xi32>
    %54 = arith.addi %11, %53 : vector<1x256xi32>
    %c256_i32_17 = arith.constant 256 : i32
    %55 = vector.broadcast %c256_i32_17 : i32 to vector<1x256xi32>
    %56 = arith.cmpi slt, %54, %55 : vector<1x256xi32>
    %57 = arith.andi %52, %56 : vector<1x256xi1>
    %c0_i32_18 = arith.constant 0 : i32
    %58 = vector.broadcast %c0_i32_18 : i32 to vector<1x256xi32>
    %59 = arith.addi %27, %58 : vector<1x256xi32>
    %c0_i32_19 = arith.constant 0 : i32
    %60 = vector.broadcast %c0_i32_19 : i32 to vector<1x256xi32>
    %61 = arith.cmpi sge, %59, %60 : vector<1x256xi32>
    %62 = arith.andi %57, %61 : vector<1x256xi1>
    %c0_i32_20 = arith.constant 0 : i32
    %63 = vector.broadcast %c0_i32_20 : i32 to vector<1x256xi32>
    %64 = arith.addi %27, %63 : vector<1x256xi32>
    %c16_i32_21 = arith.constant 16 : i32
    %65 = vector.broadcast %c16_i32_21 : i32 to vector<1x256xi32>
    %66 = arith.cmpi slt, %64, %65 : vector<1x256xi32>
    %67 = arith.andi %62, %66 : vector<1x256xi1>
    %68 = arith.extui %67 : vector<1x256xi1> to vector<1x256xi32>
    %69 = arith.sitofp %68 : vector<1x256xi32> to vector<1x256xf32>
    %c-45_i32 = arith.constant -45 : i32
    %70 = vector.broadcast %c-45_i32 : i32 to vector<1x256xi32>
    %71 = arith.addi %11, %70 : vector<1x256xi32>
    %c0_i32_22 = arith.constant 0 : i32
    %72 = vector.broadcast %c0_i32_22 : i32 to vector<1x256xi32>
    %73 = arith.cmpi sge, %71, %72 : vector<1x256xi32>
    %c-45_i32_23 = arith.constant -45 : i32
    %74 = vector.broadcast %c-45_i32_23 : i32 to vector<1x256xi32>
    %75 = arith.addi %11, %74 : vector<1x256xi32>
    %c256_i32_24 = arith.constant 256 : i32
    %76 = vector.broadcast %c256_i32_24 : i32 to vector<1x256xi32>
    %77 = arith.cmpi slt, %75, %76 : vector<1x256xi32>
    %78 = arith.andi %73, %77 : vector<1x256xi1>
    %c3_i32 = arith.constant 3 : i32
    %79 = vector.broadcast %c3_i32 : i32 to vector<1x256xi32>
    %80 = arith.addi %27, %79 : vector<1x256xi32>
    %c0_i32_25 = arith.constant 0 : i32
    %81 = vector.broadcast %c0_i32_25 : i32 to vector<1x256xi32>
    %82 = arith.cmpi sge, %80, %81 : vector<1x256xi32>
    %83 = arith.andi %78, %82 : vector<1x256xi1>
    %c3_i32_26 = arith.constant 3 : i32
    %84 = vector.broadcast %c3_i32_26 : i32 to vector<1x256xi32>
    %85 = arith.addi %27, %84 : vector<1x256xi32>
    %c16_i32_27 = arith.constant 16 : i32
    %86 = vector.broadcast %c16_i32_27 : i32 to vector<1x256xi32>
    %87 = arith.cmpi slt, %85, %86 : vector<1x256xi32>
    %88 = arith.andi %83, %87 : vector<1x256xi1>
    %89 = arith.extui %88 : vector<1x256xi1> to vector<1x256xi32>
    %90 = arith.sitofp %89 : vector<1x256xi32> to vector<1x256xf32>
    %c-3_i32_28 = arith.constant -3 : i32
    %91 = vector.broadcast %c-3_i32_28 : i32 to vector<1x256xi32>
    %92 = arith.addi %11, %91 : vector<1x256xi32>
    %c0_i32_29 = arith.constant 0 : i32
    %93 = vector.broadcast %c0_i32_29 : i32 to vector<1x256xi32>
    %94 = arith.cmpi sge, %92, %93 : vector<1x256xi32>
    %c-3_i32_30 = arith.constant -3 : i32
    %95 = vector.broadcast %c-3_i32_30 : i32 to vector<1x256xi32>
    %96 = arith.addi %11, %95 : vector<1x256xi32>
    %c256_i32_31 = arith.constant 256 : i32
    %97 = vector.broadcast %c256_i32_31 : i32 to vector<1x256xi32>
    %98 = arith.cmpi slt, %96, %97 : vector<1x256xi32>
    %99 = arith.andi %94, %98 : vector<1x256xi1>
    %c-3_i32_32 = arith.constant -3 : i32
    %100 = vector.broadcast %c-3_i32_32 : i32 to vector<1x256xi32>
    %101 = arith.addi %27, %100 : vector<1x256xi32>
    %c0_i32_33 = arith.constant 0 : i32
    %102 = vector.broadcast %c0_i32_33 : i32 to vector<1x256xi32>
    %103 = arith.cmpi sge, %101, %102 : vector<1x256xi32>
    %104 = arith.andi %99, %103 : vector<1x256xi1>
    %c-3_i32_34 = arith.constant -3 : i32
    %105 = vector.broadcast %c-3_i32_34 : i32 to vector<1x256xi32>
    %106 = arith.addi %27, %105 : vector<1x256xi32>
    %c16_i32_35 = arith.constant 16 : i32
    %107 = vector.broadcast %c16_i32_35 : i32 to vector<1x256xi32>
    %108 = arith.cmpi slt, %106, %107 : vector<1x256xi32>
    %109 = arith.andi %104, %108 : vector<1x256xi1>
    %110 = arith.extui %109 : vector<1x256xi1> to vector<1x256xi32>
    %111 = arith.sitofp %110 : vector<1x256xi32> to vector<1x256xf32>
    %c3_i32_36 = arith.constant 3 : i32
    %112 = vector.broadcast %c3_i32_36 : i32 to vector<1x256xi32>
    %113 = arith.addi %11, %112 : vector<1x256xi32>
    %c0_i32_37 = arith.constant 0 : i32
    %114 = vector.broadcast %c0_i32_37 : i32 to vector<1x256xi32>
    %115 = arith.cmpi sge, %113, %114 : vector<1x256xi32>
    %c3_i32_38 = arith.constant 3 : i32
    %116 = vector.broadcast %c3_i32_38 : i32 to vector<1x256xi32>
    %117 = arith.addi %11, %116 : vector<1x256xi32>
    %c256_i32_39 = arith.constant 256 : i32
    %118 = vector.broadcast %c256_i32_39 : i32 to vector<1x256xi32>
    %119 = arith.cmpi slt, %117, %118 : vector<1x256xi32>
    %120 = arith.andi %115, %119 : vector<1x256xi1>
    %c3_i32_40 = arith.constant 3 : i32
    %121 = vector.broadcast %c3_i32_40 : i32 to vector<1x256xi32>
    %122 = arith.addi %27, %121 : vector<1x256xi32>
    %c0_i32_41 = arith.constant 0 : i32
    %123 = vector.broadcast %c0_i32_41 : i32 to vector<1x256xi32>
    %124 = arith.cmpi sge, %122, %123 : vector<1x256xi32>
    %125 = arith.andi %120, %124 : vector<1x256xi1>
    %c3_i32_42 = arith.constant 3 : i32
    %126 = vector.broadcast %c3_i32_42 : i32 to vector<1x256xi32>
    %127 = arith.addi %27, %126 : vector<1x256xi32>
    %c16_i32_43 = arith.constant 16 : i32
    %128 = vector.broadcast %c16_i32_43 : i32 to vector<1x256xi32>
    %129 = arith.cmpi slt, %127, %128 : vector<1x256xi32>
    %130 = arith.andi %125, %129 : vector<1x256xi1>
    %131 = arith.extui %130 : vector<1x256xi1> to vector<1x256xi32>
    %132 = arith.sitofp %131 : vector<1x256xi32> to vector<1x256xf32>
    %c45_i32 = arith.constant 45 : i32
    %133 = vector.broadcast %c45_i32 : i32 to vector<1x256xi32>
    %134 = arith.addi %11, %133 : vector<1x256xi32>
    %c0_i32_44 = arith.constant 0 : i32
    %135 = vector.broadcast %c0_i32_44 : i32 to vector<1x256xi32>
    %136 = arith.cmpi sge, %134, %135 : vector<1x256xi32>
    %c45_i32_45 = arith.constant 45 : i32
    %137 = vector.broadcast %c45_i32_45 : i32 to vector<1x256xi32>
    %138 = arith.addi %11, %137 : vector<1x256xi32>
    %c256_i32_46 = arith.constant 256 : i32
    %139 = vector.broadcast %c256_i32_46 : i32 to vector<1x256xi32>
    %140 = arith.cmpi slt, %138, %139 : vector<1x256xi32>
    %141 = arith.andi %136, %140 : vector<1x256xi1>
    %c-3_i32_47 = arith.constant -3 : i32
    %142 = vector.broadcast %c-3_i32_47 : i32 to vector<1x256xi32>
    %143 = arith.addi %27, %142 : vector<1x256xi32>
    %c0_i32_48 = arith.constant 0 : i32
    %144 = vector.broadcast %c0_i32_48 : i32 to vector<1x256xi32>
    %145 = arith.cmpi sge, %143, %144 : vector<1x256xi32>
    %146 = arith.andi %141, %145 : vector<1x256xi1>
    %c-3_i32_49 = arith.constant -3 : i32
    %147 = vector.broadcast %c-3_i32_49 : i32 to vector<1x256xi32>
    %148 = arith.addi %27, %147 : vector<1x256xi32>
    %c16_i32_50 = arith.constant 16 : i32
    %149 = vector.broadcast %c16_i32_50 : i32 to vector<1x256xi32>
    %150 = arith.cmpi slt, %148, %149 : vector<1x256xi32>
    %151 = arith.andi %146, %150 : vector<1x256xi1>
    %152 = arith.extui %151 : vector<1x256xi1> to vector<1x256xi32>
    %153 = arith.sitofp %152 : vector<1x256xi32> to vector<1x256xf32>
    %c48_i32 = arith.constant 48 : i32
    %154 = vector.broadcast %c48_i32 : i32 to vector<1x256xi32>
    %155 = arith.addi %11, %154 : vector<1x256xi32>
    %c0_i32_51 = arith.constant 0 : i32
    %156 = vector.broadcast %c0_i32_51 : i32 to vector<1x256xi32>
    %157 = arith.cmpi sge, %155, %156 : vector<1x256xi32>
    %c48_i32_52 = arith.constant 48 : i32
    %158 = vector.broadcast %c48_i32_52 : i32 to vector<1x256xi32>
    %159 = arith.addi %11, %158 : vector<1x256xi32>
    %c256_i32_53 = arith.constant 256 : i32
    %160 = vector.broadcast %c256_i32_53 : i32 to vector<1x256xi32>
    %161 = arith.cmpi slt, %159, %160 : vector<1x256xi32>
    %162 = arith.andi %157, %161 : vector<1x256xi1>
    %c0_i32_54 = arith.constant 0 : i32
    %163 = vector.broadcast %c0_i32_54 : i32 to vector<1x256xi32>
    %164 = arith.addi %27, %163 : vector<1x256xi32>
    %c0_i32_55 = arith.constant 0 : i32
    %165 = vector.broadcast %c0_i32_55 : i32 to vector<1x256xi32>
    %166 = arith.cmpi sge, %164, %165 : vector<1x256xi32>
    %167 = arith.andi %162, %166 : vector<1x256xi1>
    %c0_i32_56 = arith.constant 0 : i32
    %168 = vector.broadcast %c0_i32_56 : i32 to vector<1x256xi32>
    %169 = arith.addi %27, %168 : vector<1x256xi32>
    %c16_i32_57 = arith.constant 16 : i32
    %170 = vector.broadcast %c16_i32_57 : i32 to vector<1x256xi32>
    %171 = arith.cmpi slt, %169, %170 : vector<1x256xi32>
    %172 = arith.andi %167, %171 : vector<1x256xi1>
    %173 = arith.extui %172 : vector<1x256xi1> to vector<1x256xi32>
    %174 = arith.sitofp %173 : vector<1x256xi32> to vector<1x256xf32>
    %c51_i32 = arith.constant 51 : i32
    %175 = vector.broadcast %c51_i32 : i32 to vector<1x256xi32>
    %176 = arith.addi %11, %175 : vector<1x256xi32>
    %c0_i32_58 = arith.constant 0 : i32
    %177 = vector.broadcast %c0_i32_58 : i32 to vector<1x256xi32>
    %178 = arith.cmpi sge, %176, %177 : vector<1x256xi32>
    %c51_i32_59 = arith.constant 51 : i32
    %179 = vector.broadcast %c51_i32_59 : i32 to vector<1x256xi32>
    %180 = arith.addi %11, %179 : vector<1x256xi32>
    %c256_i32_60 = arith.constant 256 : i32
    %181 = vector.broadcast %c256_i32_60 : i32 to vector<1x256xi32>
    %182 = arith.cmpi slt, %180, %181 : vector<1x256xi32>
    %183 = arith.andi %178, %182 : vector<1x256xi1>
    %c3_i32_61 = arith.constant 3 : i32
    %184 = vector.broadcast %c3_i32_61 : i32 to vector<1x256xi32>
    %185 = arith.addi %27, %184 : vector<1x256xi32>
    %c0_i32_62 = arith.constant 0 : i32
    %186 = vector.broadcast %c0_i32_62 : i32 to vector<1x256xi32>
    %187 = arith.cmpi sge, %185, %186 : vector<1x256xi32>
    %188 = arith.andi %183, %187 : vector<1x256xi1>
    %c3_i32_63 = arith.constant 3 : i32
    %189 = vector.broadcast %c3_i32_63 : i32 to vector<1x256xi32>
    %190 = arith.addi %27, %189 : vector<1x256xi32>
    %c16_i32_64 = arith.constant 16 : i32
    %191 = vector.broadcast %c16_i32_64 : i32 to vector<1x256xi32>
    %192 = arith.cmpi slt, %190, %191 : vector<1x256xi32>
    %193 = arith.andi %188, %192 : vector<1x256xi1>
    %194 = arith.extui %193 : vector<1x256xi1> to vector<1x256xi32>
    %195 = arith.sitofp %194 : vector<1x256xi32> to vector<1x256xf32>
    %c-17_i32 = arith.constant -17 : i32
    %196 = vector.broadcast %c-17_i32 : i32 to vector<1x256xi32>
    %197 = arith.addi %11, %196 : vector<1x256xi32>
    %c0_i32_65 = arith.constant 0 : i32
    %198 = vector.broadcast %c0_i32_65 : i32 to vector<1x256xi32>
    %199 = arith.cmpi sge, %197, %198 : vector<1x256xi32>
    %c-17_i32_66 = arith.constant -17 : i32
    %200 = vector.broadcast %c-17_i32_66 : i32 to vector<1x256xi32>
    %201 = arith.addi %11, %200 : vector<1x256xi32>
    %c256_i32_67 = arith.constant 256 : i32
    %202 = vector.broadcast %c256_i32_67 : i32 to vector<1x256xi32>
    %203 = arith.cmpi slt, %201, %202 : vector<1x256xi32>
    %204 = arith.andi %199, %203 : vector<1x256xi1>
    %c-1_i32 = arith.constant -1 : i32
    %205 = vector.broadcast %c-1_i32 : i32 to vector<1x256xi32>
    %206 = arith.addi %27, %205 : vector<1x256xi32>
    %c0_i32_68 = arith.constant 0 : i32
    %207 = vector.broadcast %c0_i32_68 : i32 to vector<1x256xi32>
    %208 = arith.cmpi sge, %206, %207 : vector<1x256xi32>
    %209 = arith.andi %204, %208 : vector<1x256xi1>
    %c-1_i32_69 = arith.constant -1 : i32
    %210 = vector.broadcast %c-1_i32_69 : i32 to vector<1x256xi32>
    %211 = arith.addi %27, %210 : vector<1x256xi32>
    %c16_i32_70 = arith.constant 16 : i32
    %212 = vector.broadcast %c16_i32_70 : i32 to vector<1x256xi32>
    %213 = arith.cmpi slt, %211, %212 : vector<1x256xi32>
    %214 = arith.andi %209, %213 : vector<1x256xi1>
    %215 = arith.extui %214 : vector<1x256xi1> to vector<1x256xi32>
    %216 = arith.sitofp %215 : vector<1x256xi32> to vector<1x256xf32>
    %c-16_i32 = arith.constant -16 : i32
    %217 = vector.broadcast %c-16_i32 : i32 to vector<1x256xi32>
    %218 = arith.addi %11, %217 : vector<1x256xi32>
    %c0_i32_71 = arith.constant 0 : i32
    %219 = vector.broadcast %c0_i32_71 : i32 to vector<1x256xi32>
    %220 = arith.cmpi sge, %218, %219 : vector<1x256xi32>
    %c-16_i32_72 = arith.constant -16 : i32
    %221 = vector.broadcast %c-16_i32_72 : i32 to vector<1x256xi32>
    %222 = arith.addi %11, %221 : vector<1x256xi32>
    %c256_i32_73 = arith.constant 256 : i32
    %223 = vector.broadcast %c256_i32_73 : i32 to vector<1x256xi32>
    %224 = arith.cmpi slt, %222, %223 : vector<1x256xi32>
    %225 = arith.andi %220, %224 : vector<1x256xi1>
    %c0_i32_74 = arith.constant 0 : i32
    %226 = vector.broadcast %c0_i32_74 : i32 to vector<1x256xi32>
    %227 = arith.addi %27, %226 : vector<1x256xi32>
    %c0_i32_75 = arith.constant 0 : i32
    %228 = vector.broadcast %c0_i32_75 : i32 to vector<1x256xi32>
    %229 = arith.cmpi sge, %227, %228 : vector<1x256xi32>
    %230 = arith.andi %225, %229 : vector<1x256xi1>
    %c0_i32_76 = arith.constant 0 : i32
    %231 = vector.broadcast %c0_i32_76 : i32 to vector<1x256xi32>
    %232 = arith.addi %27, %231 : vector<1x256xi32>
    %c16_i32_77 = arith.constant 16 : i32
    %233 = vector.broadcast %c16_i32_77 : i32 to vector<1x256xi32>
    %234 = arith.cmpi slt, %232, %233 : vector<1x256xi32>
    %235 = arith.andi %230, %234 : vector<1x256xi1>
    %236 = arith.extui %235 : vector<1x256xi1> to vector<1x256xi32>
    %237 = arith.sitofp %236 : vector<1x256xi32> to vector<1x256xf32>
    %c-15_i32 = arith.constant -15 : i32
    %238 = vector.broadcast %c-15_i32 : i32 to vector<1x256xi32>
    %239 = arith.addi %11, %238 : vector<1x256xi32>
    %c0_i32_78 = arith.constant 0 : i32
    %240 = vector.broadcast %c0_i32_78 : i32 to vector<1x256xi32>
    %241 = arith.cmpi sge, %239, %240 : vector<1x256xi32>
    %c-15_i32_79 = arith.constant -15 : i32
    %242 = vector.broadcast %c-15_i32_79 : i32 to vector<1x256xi32>
    %243 = arith.addi %11, %242 : vector<1x256xi32>
    %c256_i32_80 = arith.constant 256 : i32
    %244 = vector.broadcast %c256_i32_80 : i32 to vector<1x256xi32>
    %245 = arith.cmpi slt, %243, %244 : vector<1x256xi32>
    %246 = arith.andi %241, %245 : vector<1x256xi1>
    %c1_i32_81 = arith.constant 1 : i32
    %247 = vector.broadcast %c1_i32_81 : i32 to vector<1x256xi32>
    %248 = arith.addi %27, %247 : vector<1x256xi32>
    %c0_i32_82 = arith.constant 0 : i32
    %249 = vector.broadcast %c0_i32_82 : i32 to vector<1x256xi32>
    %250 = arith.cmpi sge, %248, %249 : vector<1x256xi32>
    %251 = arith.andi %246, %250 : vector<1x256xi1>
    %c1_i32_83 = arith.constant 1 : i32
    %252 = vector.broadcast %c1_i32_83 : i32 to vector<1x256xi32>
    %253 = arith.addi %27, %252 : vector<1x256xi32>
    %c16_i32_84 = arith.constant 16 : i32
    %254 = vector.broadcast %c16_i32_84 : i32 to vector<1x256xi32>
    %255 = arith.cmpi slt, %253, %254 : vector<1x256xi32>
    %256 = arith.andi %251, %255 : vector<1x256xi1>
    %257 = arith.extui %256 : vector<1x256xi1> to vector<1x256xi32>
    %258 = arith.sitofp %257 : vector<1x256xi32> to vector<1x256xf32>
    %c-1_i32_85 = arith.constant -1 : i32
    %259 = vector.broadcast %c-1_i32_85 : i32 to vector<1x256xi32>
    %260 = arith.addi %11, %259 : vector<1x256xi32>
    %c0_i32_86 = arith.constant 0 : i32
    %261 = vector.broadcast %c0_i32_86 : i32 to vector<1x256xi32>
    %262 = arith.cmpi sge, %260, %261 : vector<1x256xi32>
    %c-1_i32_87 = arith.constant -1 : i32
    %263 = vector.broadcast %c-1_i32_87 : i32 to vector<1x256xi32>
    %264 = arith.addi %11, %263 : vector<1x256xi32>
    %c256_i32_88 = arith.constant 256 : i32
    %265 = vector.broadcast %c256_i32_88 : i32 to vector<1x256xi32>
    %266 = arith.cmpi slt, %264, %265 : vector<1x256xi32>
    %267 = arith.andi %262, %266 : vector<1x256xi1>
    %c-1_i32_89 = arith.constant -1 : i32
    %268 = vector.broadcast %c-1_i32_89 : i32 to vector<1x256xi32>
    %269 = arith.addi %27, %268 : vector<1x256xi32>
    %c0_i32_90 = arith.constant 0 : i32
    %270 = vector.broadcast %c0_i32_90 : i32 to vector<1x256xi32>
    %271 = arith.cmpi sge, %269, %270 : vector<1x256xi32>
    %272 = arith.andi %267, %271 : vector<1x256xi1>
    %c-1_i32_91 = arith.constant -1 : i32
    %273 = vector.broadcast %c-1_i32_91 : i32 to vector<1x256xi32>
    %274 = arith.addi %27, %273 : vector<1x256xi32>
    %c16_i32_92 = arith.constant 16 : i32
    %275 = vector.broadcast %c16_i32_92 : i32 to vector<1x256xi32>
    %276 = arith.cmpi slt, %274, %275 : vector<1x256xi32>
    %277 = arith.andi %272, %276 : vector<1x256xi1>
    %278 = arith.extui %277 : vector<1x256xi1> to vector<1x256xi32>
    %279 = arith.sitofp %278 : vector<1x256xi32> to vector<1x256xf32>
    %c1_i32_93 = arith.constant 1 : i32
    %280 = vector.broadcast %c1_i32_93 : i32 to vector<1x256xi32>
    %281 = arith.addi %11, %280 : vector<1x256xi32>
    %c0_i32_94 = arith.constant 0 : i32
    %282 = vector.broadcast %c0_i32_94 : i32 to vector<1x256xi32>
    %283 = arith.cmpi sge, %281, %282 : vector<1x256xi32>
    %c1_i32_95 = arith.constant 1 : i32
    %284 = vector.broadcast %c1_i32_95 : i32 to vector<1x256xi32>
    %285 = arith.addi %11, %284 : vector<1x256xi32>
    %c256_i32_96 = arith.constant 256 : i32
    %286 = vector.broadcast %c256_i32_96 : i32 to vector<1x256xi32>
    %287 = arith.cmpi slt, %285, %286 : vector<1x256xi32>
    %288 = arith.andi %283, %287 : vector<1x256xi1>
    %c1_i32_97 = arith.constant 1 : i32
    %289 = vector.broadcast %c1_i32_97 : i32 to vector<1x256xi32>
    %290 = arith.addi %27, %289 : vector<1x256xi32>
    %c0_i32_98 = arith.constant 0 : i32
    %291 = vector.broadcast %c0_i32_98 : i32 to vector<1x256xi32>
    %292 = arith.cmpi sge, %290, %291 : vector<1x256xi32>
    %293 = arith.andi %288, %292 : vector<1x256xi1>
    %c1_i32_99 = arith.constant 1 : i32
    %294 = vector.broadcast %c1_i32_99 : i32 to vector<1x256xi32>
    %295 = arith.addi %27, %294 : vector<1x256xi32>
    %c16_i32_100 = arith.constant 16 : i32
    %296 = vector.broadcast %c16_i32_100 : i32 to vector<1x256xi32>
    %297 = arith.cmpi slt, %295, %296 : vector<1x256xi32>
    %298 = arith.andi %293, %297 : vector<1x256xi1>
    %299 = arith.extui %298 : vector<1x256xi1> to vector<1x256xi32>
    %300 = arith.sitofp %299 : vector<1x256xi32> to vector<1x256xf32>
    %c15_i32 = arith.constant 15 : i32
    %301 = vector.broadcast %c15_i32 : i32 to vector<1x256xi32>
    %302 = arith.addi %11, %301 : vector<1x256xi32>
    %c0_i32_101 = arith.constant 0 : i32
    %303 = vector.broadcast %c0_i32_101 : i32 to vector<1x256xi32>
    %304 = arith.cmpi sge, %302, %303 : vector<1x256xi32>
    %c15_i32_102 = arith.constant 15 : i32
    %305 = vector.broadcast %c15_i32_102 : i32 to vector<1x256xi32>
    %306 = arith.addi %11, %305 : vector<1x256xi32>
    %c256_i32_103 = arith.constant 256 : i32
    %307 = vector.broadcast %c256_i32_103 : i32 to vector<1x256xi32>
    %308 = arith.cmpi slt, %306, %307 : vector<1x256xi32>
    %309 = arith.andi %304, %308 : vector<1x256xi1>
    %c-1_i32_104 = arith.constant -1 : i32
    %310 = vector.broadcast %c-1_i32_104 : i32 to vector<1x256xi32>
    %311 = arith.addi %27, %310 : vector<1x256xi32>
    %c0_i32_105 = arith.constant 0 : i32
    %312 = vector.broadcast %c0_i32_105 : i32 to vector<1x256xi32>
    %313 = arith.cmpi sge, %311, %312 : vector<1x256xi32>
    %314 = arith.andi %309, %313 : vector<1x256xi1>
    %c-1_i32_106 = arith.constant -1 : i32
    %315 = vector.broadcast %c-1_i32_106 : i32 to vector<1x256xi32>
    %316 = arith.addi %27, %315 : vector<1x256xi32>
    %c16_i32_107 = arith.constant 16 : i32
    %317 = vector.broadcast %c16_i32_107 : i32 to vector<1x256xi32>
    %318 = arith.cmpi slt, %316, %317 : vector<1x256xi32>
    %319 = arith.andi %314, %318 : vector<1x256xi1>
    %320 = arith.extui %319 : vector<1x256xi1> to vector<1x256xi32>
    %321 = arith.sitofp %320 : vector<1x256xi32> to vector<1x256xf32>
    %c16_i32_108 = arith.constant 16 : i32
    %322 = vector.broadcast %c16_i32_108 : i32 to vector<1x256xi32>
    %323 = arith.addi %11, %322 : vector<1x256xi32>
    %c0_i32_109 = arith.constant 0 : i32
    %324 = vector.broadcast %c0_i32_109 : i32 to vector<1x256xi32>
    %325 = arith.cmpi sge, %323, %324 : vector<1x256xi32>
    %c16_i32_110 = arith.constant 16 : i32
    %326 = vector.broadcast %c16_i32_110 : i32 to vector<1x256xi32>
    %327 = arith.addi %11, %326 : vector<1x256xi32>
    %c256_i32_111 = arith.constant 256 : i32
    %328 = vector.broadcast %c256_i32_111 : i32 to vector<1x256xi32>
    %329 = arith.cmpi slt, %327, %328 : vector<1x256xi32>
    %330 = arith.andi %325, %329 : vector<1x256xi1>
    %c0_i32_112 = arith.constant 0 : i32
    %331 = vector.broadcast %c0_i32_112 : i32 to vector<1x256xi32>
    %332 = arith.addi %27, %331 : vector<1x256xi32>
    %c0_i32_113 = arith.constant 0 : i32
    %333 = vector.broadcast %c0_i32_113 : i32 to vector<1x256xi32>
    %334 = arith.cmpi sge, %332, %333 : vector<1x256xi32>
    %335 = arith.andi %330, %334 : vector<1x256xi1>
    %c0_i32_114 = arith.constant 0 : i32
    %336 = vector.broadcast %c0_i32_114 : i32 to vector<1x256xi32>
    %337 = arith.addi %27, %336 : vector<1x256xi32>
    %c16_i32_115 = arith.constant 16 : i32
    %338 = vector.broadcast %c16_i32_115 : i32 to vector<1x256xi32>
    %339 = arith.cmpi slt, %337, %338 : vector<1x256xi32>
    %340 = arith.andi %335, %339 : vector<1x256xi1>
    %341 = arith.extui %340 : vector<1x256xi1> to vector<1x256xi32>
    %342 = arith.sitofp %341 : vector<1x256xi32> to vector<1x256xf32>
    %c17_i32 = arith.constant 17 : i32
    %343 = vector.broadcast %c17_i32 : i32 to vector<1x256xi32>
    %344 = arith.addi %11, %343 : vector<1x256xi32>
    %c0_i32_116 = arith.constant 0 : i32
    %345 = vector.broadcast %c0_i32_116 : i32 to vector<1x256xi32>
    %346 = arith.cmpi sge, %344, %345 : vector<1x256xi32>
    %c17_i32_117 = arith.constant 17 : i32
    %347 = vector.broadcast %c17_i32_117 : i32 to vector<1x256xi32>
    %348 = arith.addi %11, %347 : vector<1x256xi32>
    %c256_i32_118 = arith.constant 256 : i32
    %349 = vector.broadcast %c256_i32_118 : i32 to vector<1x256xi32>
    %350 = arith.cmpi slt, %348, %349 : vector<1x256xi32>
    %351 = arith.andi %346, %350 : vector<1x256xi1>
    %c1_i32_119 = arith.constant 1 : i32
    %352 = vector.broadcast %c1_i32_119 : i32 to vector<1x256xi32>
    %353 = arith.addi %27, %352 : vector<1x256xi32>
    %c0_i32_120 = arith.constant 0 : i32
    %354 = vector.broadcast %c0_i32_120 : i32 to vector<1x256xi32>
    %355 = arith.cmpi sge, %353, %354 : vector<1x256xi32>
    %356 = arith.andi %351, %355 : vector<1x256xi1>
    %c1_i32_121 = arith.constant 1 : i32
    %357 = vector.broadcast %c1_i32_121 : i32 to vector<1x256xi32>
    %358 = arith.addi %27, %357 : vector<1x256xi32>
    %c16_i32_122 = arith.constant 16 : i32
    %359 = vector.broadcast %c16_i32_122 : i32 to vector<1x256xi32>
    %360 = arith.cmpi slt, %358, %359 : vector<1x256xi32>
    %361 = arith.andi %356, %360 : vector<1x256xi1>
    %362 = arith.extui %361 : vector<1x256xi1> to vector<1x256xi32>
    %363 = arith.sitofp %362 : vector<1x256xi32> to vector<1x256xf32>
    %c51_i32_123 = arith.constant 51 : i32
    %364 = tpu.dynamic_rotate %9 by %c51_i32_123 dim 1 : vector<8x256xf32>, i32 -> vector<8x256xf32>
    %365 = vector.broadcast %48 : vector<1x256xf32> to vector<8x256xf32>
    %366 = arith.mulf %364, %365 : vector<8x256xf32>
    %c48_i32_124 = arith.constant 48 : i32
    %367 = tpu.dynamic_rotate %9 by %c48_i32_124 dim 1 : vector<8x256xf32>, i32 -> vector<8x256xf32>
    %368 = vector.broadcast %69 : vector<1x256xf32> to vector<8x256xf32>
    %369 = arith.mulf %367, %368 : vector<8x256xf32>
    %c45_i32_125 = arith.constant 45 : i32
    %370 = tpu.dynamic_rotate %9 by %c45_i32_125 dim 1 : vector<8x256xf32>, i32 -> vector<8x256xf32>
    %371 = vector.broadcast %90 : vector<1x256xf32> to vector<8x256xf32>
    %372 = arith.mulf %370, %371 : vector<8x256xf32>
    %c3_i32_126 = arith.constant 3 : i32
    %373 = tpu.dynamic_rotate %9 by %c3_i32_126 dim 1 : vector<8x256xf32>, i32 -> vector<8x256xf32>
    %374 = vector.broadcast %111 : vector<1x256xf32> to vector<8x256xf32>
    %375 = arith.mulf %373, %374 : vector<8x256xf32>
    %c253_i32 = arith.constant 253 : i32
    %376 = tpu.dynamic_rotate %9 by %c253_i32 dim 1 : vector<8x256xf32>, i32 -> vector<8x256xf32>
    %377 = vector.broadcast %132 : vector<1x256xf32> to vector<8x256xf32>
    %378 = arith.mulf %376, %377 : vector<8x256xf32>
    %c211_i32 = arith.constant 211 : i32
    %379 = tpu.dynamic_rotate %9 by %c211_i32 dim 1 : vector<8x256xf32>, i32 -> vector<8x256xf32>
    %380 = vector.broadcast %153 : vector<1x256xf32> to vector<8x256xf32>
    %381 = arith.mulf %379, %380 : vector<8x256xf32>
    %c208_i32 = arith.constant 208 : i32
    %382 = tpu.dynamic_rotate %9 by %c208_i32 dim 1 : vector<8x256xf32>, i32 -> vector<8x256xf32>
    %383 = vector.broadcast %174 : vector<1x256xf32> to vector<8x256xf32>
    %384 = arith.mulf %382, %383 : vector<8x256xf32>
    %c205_i32 = arith.constant 205 : i32
    %385 = tpu.dynamic_rotate %9 by %c205_i32 dim 1 : vector<8x256xf32>, i32 -> vector<8x256xf32>
    %386 = vector.broadcast %195 : vector<1x256xf32> to vector<8x256xf32>
    %387 = arith.mulf %385, %386 : vector<8x256xf32>
    %388 = tpu.concatenate %366, %369, %372, %375, %9, %378, %381, %384, %387 in 0 : vector<8x256xf32>, vector<8x256xf32>, vector<8x256xf32>, vector<8x256xf32>, vector<8x256xf32>, vector<8x256xf32>, vector<8x256xf32>, vector<8x256xf32>, vector<8x256xf32> -> vector<72x256xf32>
    %c0_127 = arith.constant 0 : index
    %c0_128 = arith.constant 0 : index
    %389 = vector.load %arg4[%c0_127, %c0_128] : memref<8x72xf32, #tpu.memory_space<vmem>>, vector<8x72xf32>
    %cst_129 = arith.constant dense<0.000000e+00> : vector<8x256xf32>
    %390 = tpu.matmul %389, %388, %cst_129 {dimension_numbers = #tpu.dot_dimension_numbers<[1], [0], [0], [1], [0, 0, 1, 1], [], []>} : vector<8x72xf32>, vector<72x256xf32>, vector<8x256xf32> -> vector<8x256xf32>
    %c0_130 = arith.constant 0 : index
    %c0_131 = arith.constant 0 : index
    %391 = vector.load %arg5[%c0_130, %c0_131] : memref<8x1xf32, #tpu.memory_space<vmem>>, vector<8x1xf32>
    %392 = vector.broadcast %391 : vector<8x1xf32> to vector<8x256xf32>
    %393 = arith.addf %390, %392 : vector<8x256xf32>
    %cst_132 = arith.constant 0.000000e+00 : f32
    %394 = vector.broadcast %cst_132 : f32 to vector<8x256xf32>
    %395 = arith.maximumf %393, %394 : vector<8x256xf32>
    %c51_i32_133 = arith.constant 51 : i32
    %396 = tpu.dynamic_rotate %395 by %c51_i32_133 dim 1 : vector<8x256xf32>, i32 -> vector<8x256xf32>
    %397 = vector.broadcast %48 : vector<1x256xf32> to vector<8x256xf32>
    %398 = arith.mulf %396, %397 : vector<8x256xf32>
    %c48_i32_134 = arith.constant 48 : i32
    %399 = tpu.dynamic_rotate %395 by %c48_i32_134 dim 1 : vector<8x256xf32>, i32 -> vector<8x256xf32>
    %400 = vector.broadcast %69 : vector<1x256xf32> to vector<8x256xf32>
    %401 = arith.mulf %399, %400 : vector<8x256xf32>
    %c45_i32_135 = arith.constant 45 : i32
    %402 = tpu.dynamic_rotate %395 by %c45_i32_135 dim 1 : vector<8x256xf32>, i32 -> vector<8x256xf32>
    %403 = vector.broadcast %90 : vector<1x256xf32> to vector<8x256xf32>
    %404 = arith.mulf %402, %403 : vector<8x256xf32>
    %c3_i32_136 = arith.constant 3 : i32
    %405 = tpu.dynamic_rotate %395 by %c3_i32_136 dim 1 : vector<8x256xf32>, i32 -> vector<8x256xf32>
    %406 = vector.broadcast %111 : vector<1x256xf32> to vector<8x256xf32>
    %407 = arith.mulf %405, %406 : vector<8x256xf32>
    %c253_i32_137 = arith.constant 253 : i32
    %408 = tpu.dynamic_rotate %395 by %c253_i32_137 dim 1 : vector<8x256xf32>, i32 -> vector<8x256xf32>
    %409 = vector.broadcast %132 : vector<1x256xf32> to vector<8x256xf32>
    %410 = arith.mulf %408, %409 : vector<8x256xf32>
    %c211_i32_138 = arith.constant 211 : i32
    %411 = tpu.dynamic_rotate %395 by %c211_i32_138 dim 1 : vector<8x256xf32>, i32 -> vector<8x256xf32>
    %412 = vector.broadcast %153 : vector<1x256xf32> to vector<8x256xf32>
    %413 = arith.mulf %411, %412 : vector<8x256xf32>
    %c208_i32_139 = arith.constant 208 : i32
    %414 = tpu.dynamic_rotate %395 by %c208_i32_139 dim 1 : vector<8x256xf32>, i32 -> vector<8x256xf32>
    %415 = vector.broadcast %174 : vector<1x256xf32> to vector<8x256xf32>
    %416 = arith.mulf %414, %415 : vector<8x256xf32>
    %c205_i32_140 = arith.constant 205 : i32
    %417 = tpu.dynamic_rotate %395 by %c205_i32_140 dim 1 : vector<8x256xf32>, i32 -> vector<8x256xf32>
    %418 = vector.broadcast %195 : vector<1x256xf32> to vector<8x256xf32>
    %419 = arith.mulf %417, %418 : vector<8x256xf32>
    %420 = tpu.concatenate %398, %401, %404, %407, %395, %410, %413, %416, %419 in 0 : vector<8x256xf32>, vector<8x256xf32>, vector<8x256xf32>, vector<8x256xf32>, vector<8x256xf32>, vector<8x256xf32>, vector<8x256xf32>, vector<8x256xf32>, vector<8x256xf32> -> vector<72x256xf32>
    %c0_141 = arith.constant 0 : index
    %c0_142 = arith.constant 0 : index
    %421 = vector.load %arg6[%c0_141, %c0_142] : memref<8x72xf32, #tpu.memory_space<vmem>>, vector<8x72xf32>
    %cst_143 = arith.constant dense<0.000000e+00> : vector<8x256xf32>
    %422 = tpu.matmul %421, %420, %cst_143 {dimension_numbers = #tpu.dot_dimension_numbers<[1], [0], [0], [1], [0, 0, 1, 1], [], []>} : vector<8x72xf32>, vector<72x256xf32>, vector<8x256xf32> -> vector<8x256xf32>
    %c0_144 = arith.constant 0 : index
    %c0_145 = arith.constant 0 : index
    %423 = vector.load %arg7[%c0_144, %c0_145] : memref<8x1xf32, #tpu.memory_space<vmem>>, vector<8x1xf32>
    %424 = vector.broadcast %423 : vector<8x1xf32> to vector<8x256xf32>
    %425 = arith.addf %422, %424 : vector<8x256xf32>
    %cst_146 = arith.constant 0.000000e+00 : f32
    %426 = vector.broadcast %cst_146 : f32 to vector<8x256xf32>
    %427 = arith.maximumf %425, %426 : vector<8x256xf32>
    %c51_i32_147 = arith.constant 51 : i32
    %428 = tpu.dynamic_rotate %427 by %c51_i32_147 dim 1 : vector<8x256xf32>, i32 -> vector<8x256xf32>
    %429 = vector.broadcast %48 : vector<1x256xf32> to vector<8x256xf32>
    %430 = arith.mulf %428, %429 : vector<8x256xf32>
    %c48_i32_148 = arith.constant 48 : i32
    %431 = tpu.dynamic_rotate %427 by %c48_i32_148 dim 1 : vector<8x256xf32>, i32 -> vector<8x256xf32>
    %432 = vector.broadcast %69 : vector<1x256xf32> to vector<8x256xf32>
    %433 = arith.mulf %431, %432 : vector<8x256xf32>
    %c45_i32_149 = arith.constant 45 : i32
    %434 = tpu.dynamic_rotate %427 by %c45_i32_149 dim 1 : vector<8x256xf32>, i32 -> vector<8x256xf32>
    %435 = vector.broadcast %90 : vector<1x256xf32> to vector<8x256xf32>
    %436 = arith.mulf %434, %435 : vector<8x256xf32>
    %c3_i32_150 = arith.constant 3 : i32
    %437 = tpu.dynamic_rotate %427 by %c3_i32_150 dim 1 : vector<8x256xf32>, i32 -> vector<8x256xf32>
    %438 = vector.broadcast %111 : vector<1x256xf32> to vector<8x256xf32>
    %439 = arith.mulf %437, %438 : vector<8x256xf32>
    %c253_i32_151 = arith.constant 253 : i32
    %440 = tpu.dynamic_rotate %427 by %c253_i32_151 dim 1 : vector<8x256xf32>, i32 -> vector<8x256xf32>
    %441 = vector.broadcast %132 : vector<1x256xf32> to vector<8x256xf32>
    %442 = arith.mulf %440, %441 : vector<8x256xf32>
    %c211_i32_152 = arith.constant 211 : i32
    %443 = tpu.dynamic_rotate %427 by %c211_i32_152 dim 1 : vector<8x256xf32>, i32 -> vector<8x256xf32>
    %444 = vector.broadcast %153 : vector<1x256xf32> to vector<8x256xf32>
    %445 = arith.mulf %443, %444 : vector<8x256xf32>
    %c208_i32_153 = arith.constant 208 : i32
    %446 = tpu.dynamic_rotate %427 by %c208_i32_153 dim 1 : vector<8x256xf32>, i32 -> vector<8x256xf32>
    %447 = vector.broadcast %174 : vector<1x256xf32> to vector<8x256xf32>
    %448 = arith.mulf %446, %447 : vector<8x256xf32>
    %c205_i32_154 = arith.constant 205 : i32
    %449 = tpu.dynamic_rotate %427 by %c205_i32_154 dim 1 : vector<8x256xf32>, i32 -> vector<8x256xf32>
    %450 = vector.broadcast %195 : vector<1x256xf32> to vector<8x256xf32>
    %451 = arith.mulf %449, %450 : vector<8x256xf32>
    %452 = tpu.concatenate %430, %433, %436, %439, %427, %442, %445, %448, %451 in 0 : vector<8x256xf32>, vector<8x256xf32>, vector<8x256xf32>, vector<8x256xf32>, vector<8x256xf32>, vector<8x256xf32>, vector<8x256xf32>, vector<8x256xf32>, vector<8x256xf32> -> vector<72x256xf32>
    %c0_155 = arith.constant 0 : index
    %c0_156 = arith.constant 0 : index
    %453 = vector.load %arg8[%c0_155, %c0_156] : memref<8x72xf32, #tpu.memory_space<vmem>>, vector<8x72xf32>
    %cst_157 = arith.constant dense<0.000000e+00> : vector<8x256xf32>
    %454 = tpu.matmul %453, %452, %cst_157 {dimension_numbers = #tpu.dot_dimension_numbers<[1], [0], [0], [1], [0, 0, 1, 1], [], []>} : vector<8x72xf32>, vector<72x256xf32>, vector<8x256xf32> -> vector<8x256xf32>
    %c0_158 = arith.constant 0 : index
    %c0_159 = arith.constant 0 : index
    %455 = vector.load %arg9[%c0_158, %c0_159] : memref<8x1xf32, #tpu.memory_space<vmem>>, vector<8x1xf32>
    %456 = vector.broadcast %455 : vector<8x1xf32> to vector<8x256xf32>
    %457 = arith.addf %454, %456 : vector<8x256xf32>
    %cst_160 = arith.constant 0.000000e+00 : f32
    %458 = vector.broadcast %cst_160 : f32 to vector<8x256xf32>
    %459 = arith.maximumf %457, %458 : vector<8x256xf32>
    %cst_161 = arith.constant dense<0.000000e+00> : vector<8xf32>
    %460 = vector.multi_reduction <add>, %10, %cst_161 [1] : vector<8x256xf32> to vector<8xf32>
    %461 = vector.shape_cast %460 : vector<8xf32> to vector<8x1xf32>
    %cst_162 = arith.constant 2.560000e+02 : f32
    %462 = vector.broadcast %cst_162 : f32 to vector<8x1xf32>
    %463 = arith.divf %461, %462 : vector<8x1xf32>
    %464 = vector.shape_cast %463 : vector<8x1xf32> to vector<8x1xf32>
    %465 = vector.broadcast %464 : vector<8x1xf32> to vector<8x256xf32>
    %c0_163 = arith.constant 0 : index
    %c0_164 = arith.constant 0 : index
    %466 = vector.load %arg10[%c0_163, %c0_164] : memref<8x8xf32, #tpu.memory_space<vmem>>, vector<8x8xf32>
    %cst_165 = arith.constant dense<0.000000e+00> : vector<8x256xf32>
    %467 = tpu.matmul %466, %465, %cst_165 {dimension_numbers = #tpu.dot_dimension_numbers<[1], [0], [0], [1], [0, 0, 1, 1], [], []>} : vector<8x8xf32>, vector<8x256xf32>, vector<8x256xf32> -> vector<8x256xf32>
    %c0_166 = arith.constant 0 : index
    %c0_167 = arith.constant 0 : index
    %468 = vector.load %arg11[%c0_166, %c0_167] : memref<8x1xf32, #tpu.memory_space<vmem>>, vector<8x1xf32>
    %469 = vector.broadcast %468 : vector<8x1xf32> to vector<8x256xf32>
    %470 = arith.addf %467, %469 : vector<8x256xf32>
    %cst_168 = arith.constant 0.000000e+00 : f32
    %471 = vector.broadcast %cst_168 : f32 to vector<8x256xf32>
    %472 = arith.maximumf %470, %471 : vector<8x256xf32>
    %473 = tpu.concatenate %472, %9, %395, %427, %459 in 0 : vector<8x256xf32>, vector<8x256xf32>, vector<8x256xf32>, vector<8x256xf32>, vector<8x256xf32> -> vector<40x256xf32>
    %c0_169 = arith.constant 0 : index
    %c0_170 = arith.constant 0 : index
    %474 = vector.load %arg12[%c0_169, %c0_170] : memref<8x40xf32, #tpu.memory_space<vmem>>, vector<8x40xf32>
    %cst_171 = arith.constant dense<0.000000e+00> : vector<8x256xf32>
    %475 = tpu.matmul %474, %473, %cst_171 {dimension_numbers = #tpu.dot_dimension_numbers<[1], [0], [0], [1], [0, 0, 1, 1], [], []>} : vector<8x40xf32>, vector<40x256xf32>, vector<8x256xf32> -> vector<8x256xf32>
    %c0_172 = arith.constant 0 : index
    %c0_173 = arith.constant 0 : index
    %476 = vector.load %arg13[%c0_172, %c0_173] : memref<8x1xf32, #tpu.memory_space<vmem>>, vector<8x1xf32>
    %477 = vector.broadcast %476 : vector<8x1xf32> to vector<8x256xf32>
    %478 = arith.addf %475, %477 : vector<8x256xf32>
    %cst_174 = arith.constant 0.000000e+00 : f32
    %479 = vector.broadcast %cst_174 : f32 to vector<8x256xf32>
    %480 = arith.maximumf %478, %479 : vector<8x256xf32>
    %c17_i32_175 = arith.constant 17 : i32
    %481 = tpu.dynamic_rotate %480 by %c17_i32_175 dim 1 : vector<8x256xf32>, i32 -> vector<8x256xf32>
    %482 = vector.broadcast %216 : vector<1x256xf32> to vector<8x256xf32>
    %483 = arith.mulf %481, %482 : vector<8x256xf32>
    %c16_i32_176 = arith.constant 16 : i32
    %484 = tpu.dynamic_rotate %480 by %c16_i32_176 dim 1 : vector<8x256xf32>, i32 -> vector<8x256xf32>
    %485 = vector.broadcast %237 : vector<1x256xf32> to vector<8x256xf32>
    %486 = arith.mulf %484, %485 : vector<8x256xf32>
    %c15_i32_177 = arith.constant 15 : i32
    %487 = tpu.dynamic_rotate %480 by %c15_i32_177 dim 1 : vector<8x256xf32>, i32 -> vector<8x256xf32>
    %488 = vector.broadcast %258 : vector<1x256xf32> to vector<8x256xf32>
    %489 = arith.mulf %487, %488 : vector<8x256xf32>
    %c1_i32_178 = arith.constant 1 : i32
    %490 = tpu.dynamic_rotate %480 by %c1_i32_178 dim 1 : vector<8x256xf32>, i32 -> vector<8x256xf32>
    %491 = vector.broadcast %279 : vector<1x256xf32> to vector<8x256xf32>
    %492 = arith.mulf %490, %491 : vector<8x256xf32>
    %c255_i32 = arith.constant 255 : i32
    %493 = tpu.dynamic_rotate %480 by %c255_i32 dim 1 : vector<8x256xf32>, i32 -> vector<8x256xf32>
    %494 = vector.broadcast %300 : vector<1x256xf32> to vector<8x256xf32>
    %495 = arith.mulf %493, %494 : vector<8x256xf32>
    %c241_i32 = arith.constant 241 : i32
    %496 = tpu.dynamic_rotate %480 by %c241_i32 dim 1 : vector<8x256xf32>, i32 -> vector<8x256xf32>
    %497 = vector.broadcast %321 : vector<1x256xf32> to vector<8x256xf32>
    %498 = arith.mulf %496, %497 : vector<8x256xf32>
    %c240_i32 = arith.constant 240 : i32
    %499 = tpu.dynamic_rotate %480 by %c240_i32 dim 1 : vector<8x256xf32>, i32 -> vector<8x256xf32>
    %500 = vector.broadcast %342 : vector<1x256xf32> to vector<8x256xf32>
    %501 = arith.mulf %499, %500 : vector<8x256xf32>
    %c239_i32 = arith.constant 239 : i32
    %502 = tpu.dynamic_rotate %480 by %c239_i32 dim 1 : vector<8x256xf32>, i32 -> vector<8x256xf32>
    %503 = vector.broadcast %363 : vector<1x256xf32> to vector<8x256xf32>
    %504 = arith.mulf %502, %503 : vector<8x256xf32>
    %505 = tpu.concatenate %483, %486, %489, %492, %480, %495, %498, %501, %504 in 0 : vector<8x256xf32>, vector<8x256xf32>, vector<8x256xf32>, vector<8x256xf32>, vector<8x256xf32>, vector<8x256xf32>, vector<8x256xf32>, vector<8x256xf32>, vector<8x256xf32> -> vector<72x256xf32>
    %c0_179 = arith.constant 0 : index
    %c0_180 = arith.constant 0 : index
    %506 = vector.load %arg14[%c0_179, %c0_180] : memref<8x72xf32, #tpu.memory_space<vmem>>, vector<8x72xf32>
    %cst_181 = arith.constant dense<0.000000e+00> : vector<8x256xf32>
    %507 = tpu.matmul %506, %505, %cst_181 {dimension_numbers = #tpu.dot_dimension_numbers<[1], [0], [0], [1], [0, 0, 1, 1], [], []>} : vector<8x72xf32>, vector<72x256xf32>, vector<8x256xf32> -> vector<8x256xf32>
    %c0_182 = arith.constant 0 : index
    %c0_183 = arith.constant 0 : index
    %508 = vector.load %arg15[%c0_182, %c0_183] : memref<8x1xf32, #tpu.memory_space<vmem>>, vector<8x1xf32>
    %509 = vector.broadcast %508 : vector<8x1xf32> to vector<8x256xf32>
    %510 = arith.addf %507, %509 : vector<8x256xf32>
    %cst_184 = arith.constant 0.000000e+00 : f32
    %511 = vector.broadcast %cst_184 : f32 to vector<8x256xf32>
    %512 = arith.maximumf %510, %511 : vector<8x256xf32>
    %c0_185 = arith.constant 0 : index
    %c0_186 = arith.constant 0 : index
    %c0_187 = arith.constant 0 : index
    %513 = vector.load %arg16[%c0_185, %c0_186, %c0_187] : memref<1x8x256xf32, #tpu.memory_space<vmem>>, vector<1x8x256xf32>
    %514 = vector.shape_cast %513 : vector<1x8x256xf32> to vector<8x256xf32>
    %515 = vector.shape_cast %512 : vector<8x256xf32> to vector<1x8x256xf32>
    tpu.vector_store %arg16[%c0_185, %c0_186, %c0_187], %515 {strides = array<i32>} : memref<1x8x256xf32, #tpu.memory_space<vmem>>, vector<1x8x256xf32>,
    return
  }
  func.func @transform_0(%arg0: i32) -> (i32, i32, i32) {
    %c0_i32 = arith.constant 0 : i32
    %c0_i32_0 = arith.constant 0 : i32
    %c0_i32_1 = arith.constant 0 : i32
    return %arg0, %c0_i32, %c0_i32_0 : i32, i32, i32
  }
  func.func @transform_1(%arg0: i32) -> (i32, i32) {
    %c0_i32 = arith.constant 0 : i32
    %c0_i32_0 = arith.constant 0 : i32
    %c0_i32_1 = arith.constant 0 : i32
    return %c0_i32, %c0_i32_0 : i32, i32
  }
  func.func @transform_2(%arg0: i32) -> (i32, i32) {
    %c0_i32 = arith.constant 0 : i32
    %c0_i32_0 = arith.constant 0 : i32
    %c0_i32_1 = arith.constant 0 : i32
    return %c0_i32, %c0_i32_0 : i32, i32
  }
  func.func @transform_3(%arg0: i32) -> (i32, i32) {
    %c0_i32 = arith.constant 0 : i32
    %c0_i32_0 = arith.constant 0 : i32
    %c0_i32_1 = arith.constant 0 : i32
    return %c0_i32, %c0_i32_0 : i32, i32
  }
  func.func @transform_4(%arg0: i32) -> (i32, i32) {
    %c0_i32 = arith.constant 0 : i32
    %c0_i32_0 = arith.constant 0 : i32
    %c0_i32_1 = arith.constant 0 : i32
    return %c0_i32, %c0_i32_0 : i32, i32
  }
  func.func @transform_5(%arg0: i32) -> (i32, i32) {
    %c0_i32 = arith.constant 0 : i32
    %c0_i32_0 = arith.constant 0 : i32
    %c0_i32_1 = arith.constant 0 : i32
    return %c0_i32, %c0_i32_0 : i32, i32
  }
  func.func @transform_6(%arg0: i32) -> (i32, i32) {
    %c0_i32 = arith.constant 0 : i32
    %c0_i32_0 = arith.constant 0 : i32
    %c0_i32_1 = arith.constant 0 : i32
    return %c0_i32, %c0_i32_0 : i32, i32
  }
  func.func @transform_7(%arg0: i32) -> (i32, i32) {
    %c0_i32 = arith.constant 0 : i32
    %c0_i32_0 = arith.constant 0 : i32
    %c0_i32_1 = arith.constant 0 : i32
    return %c0_i32, %c0_i32_0 : i32, i32
  }
  func.func @transform_8(%arg0: i32) -> (i32, i32) {
    %c0_i32 = arith.constant 0 : i32
    %c0_i32_0 = arith.constant 0 : i32
    %c0_i32_1 = arith.constant 0 : i32
    return %c0_i32, %c0_i32_0 : i32, i32
  }
  func.func @transform_9(%arg0: i32) -> (i32, i32) {
    %c0_i32 = arith.constant 0 : i32
    %c0_i32_0 = arith.constant 0 : i32
    %c0_i32_1 = arith.constant 0 : i32
    return %c0_i32, %c0_i32_0 : i32, i32
  }
  func.func @transform_10(%arg0: i32) -> (i32, i32) {
    %c0_i32 = arith.constant 0 : i32
    %c0_i32_0 = arith.constant 0 : i32
    %c0_i32_1 = arith.constant 0 : i32
    return %c0_i32, %c0_i32_0 : i32, i32
  }
  func.func @transform_11(%arg0: i32) -> (i32, i32) {
    %c0_i32 = arith.constant 0 : i32
    %c0_i32_0 = arith.constant 0 : i32
    %c0_i32_1 = arith.constant 0 : i32
    return %c0_i32, %c0_i32_0 : i32, i32
  }
  func.func @transform_12(%arg0: i32) -> (i32, i32) {
    %c0_i32 = arith.constant 0 : i32
    %c0_i32_0 = arith.constant 0 : i32
    %c0_i32_1 = arith.constant 0 : i32
    return %c0_i32, %c0_i32_0 : i32, i32
  }
  func.func @transform_13(%arg0: i32) -> (i32, i32) {
    %c0_i32 = arith.constant 0 : i32
    %c0_i32_0 = arith.constant 0 : i32
    %c0_i32_1 = arith.constant 0 : i32
    return %c0_i32, %c0_i32_0 : i32, i32
  }
  func.func @transform_14(%arg0: i32) -> (i32, i32) {
    %c0_i32 = arith.constant 0 : i32
    %c0_i32_0 = arith.constant 0 : i32
    %c0_i32_1 = arith.constant 0 : i32
    return %c0_i32, %c0_i32_0 : i32, i32
  }
  func.func @transform_15(%arg0: i32) -> (i32, i32, i32) {
    %c0_i32 = arith.constant 0 : i32
    %c0_i32_0 = arith.constant 0 : i32
    %c0_i32_1 = arith.constant 0 : i32
    return %arg0, %c0_i32, %c0_i32_0 : i32, i32, i32
  }
}

</mosaic_0001>

<bundles_post_ra>
// kernel: tpu_custom_call.1
= control target key start
LH: loop header
LB: loop body
LE: loop exit
PB: predicated region body
PF: predicated region fallthrough
CT: control target
= control target key end

     0   :  { %s2412_s0 = inlined_call_operand.vmem [shape: f32[2,4,256], index: 0, kind: input, shape index: {}]   ;;  %s2413_s1 = inlined_call_operand.vmem [shape: f32[16,4], index: 1, kind: input, shape index: {}]   ;;  %s2414_s2 = inlined_call_operand.vmem [shape: f32[16,1], index: 2, kind: input, shape index: {}]   ;;  %s2415_s3 = inlined_call_operand.vmem [shape: f32[8,72], index: 3, kind: input, shape index: {}]   ;;  %s2416_s4 = inlined_call_operand.vmem [shape: f32[8,1], index: 4, kind: input, shape index: {}]   ;;  %s2417_s5 = inlined_call_operand.vmem [shape: f32[8,72], index: 5, kind: input, shape index: {}]   ;;  %s2418_s6 = inlined_call_operand.vmem [shape: f32[8,1], index: 6, kind: input, shape index: {}]   ;;  %s2419_s7 = inlined_call_operand.vmem [shape: f32[8,72], index: 7, kind: input, shape index: {}]   ;;  %s2420_s8 = inlined_call_operand.vmem [shape: f32[8,1], index: 8, kind: input, shape index: {}]   ;;  %s2421_s9 = inlined_call_operand.vmem [shape: f32[8,8], index: 9, kind: input, shape index: {}]   ;;  %s2422_s10 = inlined_call_operand.vmem [shape: f32[8,1], index: 10, kind: input, shape index: {}]   ;;  %s2423_s11 = inlined_call_operand.vmem [shape: f32[8,40], index: 11, kind: input, shape index: {}]   ;;  %s2424_s12 = inlined_call_operand.vmem [shape: f32[8,1], index: 12, kind: input, shape index: {}]   ;;  %s2425_s13 = inlined_call_operand.vmem [shape: f32[8,72], index: 13, kind: input, shape index: {}]   ;;  %s2426_s14 = inlined_call_operand.vmem [shape: f32[8,1], index: 14, kind: input, shape index: {}]   ;;  %s2427_s15 = inlined_call_operand.hbm [shape: f32[2,8,256], index: 15, kind: output, shape index: {}]  }
   0x1   :  { %2439 = sst [smem:[#allocation8_spill]] %s2412_s0 }
   0x2   :  { %2440 = sst [smem:[#allocation9_spill]] %s2413_s1 }
   0x3   :  { %2441 = sst [smem:[#allocation10_spill]] %s2414_s2 }
   0x4   :  { %20 = vsyncpa [#allocation3], 0 }
   0x5   :  { %22 = vsyncpa [#allocation3 + $0x1], 0  ;;  %s1825_s18 = smov 0   ;;  %s1827_s19 = smov 0  }
   0x6   :  { %s1829_s20 = smov 0   ;;  %s1831_s21 = smov 0  }
   0x7 LB: > { %2442 = sst [smem:[#allocation5_spill]] %s1720_s20  ;;  %s1846_s22 = sadd.s32 4294967295, %s1724_s21   ;;  %s1724_s21 = sphi %s1831_s21, %s2454_s21   ;;  %s1720_s20 = sphi %s1829_s20, %s2456_s20   ;;  %s1716_s19 = sphi %s1827_s19, %s2458_s19   ;;  %s1712_s18 = sphi %s1825_s18, %s2457_s18  }
   0x8   : > { %s1540_s23 = sadd.s32 4294967294, %s1724_s21   ;;  %s1850_s24 = sadd.s32 1, %s1724_s21  }
   0x9   : > { %2443 = sst [smem:[#allocation6_spill]] %s1850_s24  ;;  %s355_s25 = sadd.s32 1, %s1720_s20 }
   0xa   : > { %s352_s26 = ssub.s32 %s1724_s21, %s1850_s24  ;;  %p365_p0 = scmp.ne.s32.totalorder %s1720_s20, %s1716_s19 }
   0xb   : > { %p353_p1 = scmp.eq.s32.totalorder %s352_s26, 0  ;;  %p366_p2 = scmp.eq.s32.totalorder %s1846_s22, 1 }
   0xc   : > { %p371_p3 = scmp.ne.s32.totalorder %s1716_s19, %s1712_s18  ;;  %p372_p4 = scmp.eq.s32.totalorder %s1540_s23, 1 }
   0xd   : > { %s1861_s27 = scalar_select %p353_p1, %s1720_s20, %s355_s25  }
   0xe   : > { %p1863_p5 = por %p366_p2, %p365_p0  ;;  %p1867_p6 = por %p372_p4, %p371_p3 }
   0xf   : > { %2444 = sst [smem:[#allocation7_spill]] %s1861_s27  ;;  %p1543_p7 = scmp.ge.s32.totalorder %s1724_s21, 1 }
  0x10   : > { %p440_p8 = scmp.lt.s32.totalorder %s1724_s21, 3 }
  0x12   : > { %p441_p9 = pnand %p1543_p7, %p440_p8 }
  0x13   : > { %p488_p10 = scmp.lt.s32.totalorder (!%p441_p9), %s1846_s22, 1  ;;  %s2447_s2 = sld [smem:[#allocation10_spill]] (!%p441_p9) }
  0x14   : > { %444 = sbr.rel (%p441_p9) target bundleno = 1514 (0x5ea), region = 80  ;;  %s2448_s0 = sld [smem:[#allocation8_spill]] (!%p441_p9) }
  0x15   : > { %s2449_s1 = sld [smem:[#allocation9_spill]] (!%p441_p9)  ;;  %s1727_s20 = smov (!%p441_p9), 80  }
  0x16   : > { %s1728_s24 = smov (!%p441_p9), 77   ;;  %s2437_s30 = smov (!%p441_p9), 125  }
  0x17   : > { %s1731_s16 = smov (!%p441_p9), 3   ;;  %s2433_s25 = smov (!%p441_p9), 51  }
  0x18   : > { %s1739_s26 = smov (!%p441_p9), 112  }
  0x19   : > { %v496_v0 = vld [vmem:[%s2447_s2] sm:$0xff]  ;;  %v1726_v1 = vmov 0   ;;  %s489_s17 = scalar_select %p488_p10, %s1846_s22, 1  ;;  %vm519_vm0 = vcmask 1043456   ;;  %vm512_vm1 = vcmask 31744   ;;  %v574_v13 = vlaneseq }
  0x1a   : > { %1657 = vset.pattern.permute.xlu0 %v1726_v1  ;;  %1658 = vset.pattern.permute.xlu2 %v1726_v1  ;;  %v1735_v25 = vmov 0.0   ;;  %v958_v51 = vld [vmem:[%s2416_s4] sm:$0xff] }
  0x1b   : > { %500 = vperm.xlu0 %1657, %v496_v0   ;;  %1659 = vset.pattern.permute.xlu1 %v1726_v1  ;;  %s1597_s23 = sshll.u32 %s489_s17, 3  ;;  %v494_v3 = vld [vmem:[%s2449_s1] sm:$0xff]  ;;  %s2435_s17 = smov 45   ;;  %v1922_v14 = vand.u32 127, %v574_v13 }
  0x1c   : > { %s492_s27 = scalar_lea.vmem %s2448_s0, %s1597_s23  ;;  %s2431_s23 = smov 48  }
  0x1d   : > { %v493_v2 = vld [vmem:[%s492_s27] sm:$0xff]  ;;  %s1729_s27 = smov 83   ;;  %v1925_v15 = vadd.s32 128, %v1922_v14  ;;  %v1931_v17 = vand.u32 15, %v1922_v14  ;;  %vm952_vm6 = vcmp.lt.s32.totalorder %v1922_v14, 77  ;;  %vm943_vm11 = vcmp.lt.s32.totalorder %v1922_v14, 80 }
  0x1e   : > { %509 = vst [vmem:[#allocation1] ss:$2 sm:$0xff] %v493_v2  ;;  %vm934_vm13 = vcmp.lt.s32.totalorder %v1922_v14, 83  ;;  %v665_v50 = vadd.s32 4294967293, %v1922_v14  ;;  %v643_v53 = vadd.s32 4294967251, %v1922_v14  ;;  %v623_v0 = vadd.s32 4294967248, %v1922_v14 }
  0x1f   : > { %v1928_v16 = vand.u32 15, %v1925_v15  ;;  %v730_v19 = vadd.s32 51, %v1925_v15  ;;  %v1938_v21 = vadd.s32 3, %v1931_v17  ;;  %v698_v23 = vadd.s32 45, %v1925_v15 }
  0x20   : > { %v714_v28 = vadd.s32 48, %v1925_v15  ;;  %v1959_v30 = vadd.s32 4294967293, %v1931_v17  ;;  %v682_v36 = vadd.s32 3, %v1925_v15 }
  0x21   : > { %v1934_v18 = vadd.s32 3, %v1928_v16  ;;  %vm734_vm3 = vcmp.lt.s32.totalorder %v730_v19, 256  ;;  %vm657_vm4 = vcmp.lt.s32.totalorder %v1938_v21, 16  ;;  %v1946_v22 = vadd.s32 4294967293, %v1928_v16 }
  0x22   : > { %v1952_v26 = vsel %vm657_vm4, 1.0, %v1735_v25  ;;  %vm702_vm8 = vcmp.lt.s32.totalorder %v698_v23, 256  ;;  %vm718_vm9 = vcmp.lt.s32.totalorder %v714_v28, 256  ;;  %vm611_vm10 = vcmp.ge.s32.totalorder %v1959_v30, 0  ;;  %v957_v30 = vld [vmem:[%s2415_s3] sm:$0xff] }
  0x23   : > { %vm658_vm2 = vcmp.lt.s32.totalorder %v1934_v18, 16  ;;  %vm612_vm7 = vcmp.ge.s32.totalorder %v1946_v22, 0  ;;  %v1975_v37 = vsel %vm718_vm9, 1.0, %v1735_v25  ;;  %v1980_v39 = vsel %vm611_vm10, 1.0, %v1735_v25 }
  0x24   : > { %vm740_vm5 = vmand %vm734_vm3, %vm658_vm2  ;;  %vm686_vm14 = vcmp.lt.s32.totalorder %v682_v36, 256  ;;  %vm667_vm3 = vcmp.ge.s32.totalorder %v665_v50, 0  ;;  %vm916_vm9 = vcmp.lt.s32.totalorder %v1922_v14, 3  ;;  %v2023_v61 = vsel %vm612_vm7, 1.0, %v1735_v25  ;;  %v495_v36 = vld [vmem:[%s2449_s1 + $0x8] sm:$0xff] }
  0x25   : > { %v510_v4 = vld.sshfl [vmem:[#allocation1] sm:$0xff pattern:$0x75316420]  ;;  %v511_v5 = vld.sshfl [vmem:[#allocation1 + $0x8] sm:$0xff pattern:$0x75316420]  ;;  %vm706_vm12 = vmand %vm702_vm8, %vm612_vm7 }
  0x26   : > { %1547 = vmatpush.msk.msra.mxu0 %vm519_vm0, %v510_v4  ;;  %1550 = vmatpush.msk.msra.mxu1 %vm519_vm0, %v511_v5  ;;  %v1955_v27 = vsel %vm740_vm5, 1.0, %v1735_v25  ;;  %v1987_v43 = vsel %vm706_vm12, 1.0, %v1735_v25  ;;  %vm692_vm15 = vmand %vm686_vm14, %vm658_vm2  ;;  %vm925_vm0 = vcmp.lt.s32.totalorder %v1922_v14, 125  ;;  %vm645_vm5 = vcmp.ge.s32.totalorder %v643_v53, 0 }
  0x27   : > { %1548 = vmatmul.msk.f32.vlgmr.msra.gmra.mxu0 %vm512_vm1, %v494_v3  ;;  %1551 = vmatmul.msk.f32.vlgmr.msra.gmra.mxu1 %vm512_vm1, %v494_v3  ;;  %v2004_v52 = vsel %vm692_vm15, 1.0, %v1735_v25  ;;  %vm673_vm8 = vmand %vm667_vm3, %vm611_vm10  ;;  %vm907_vm14 = vcmp.lt.s32.totalorder %v1922_v14, 45  ;;  %v2040_v5 = vsel %vm658_vm2, 1.0, %v1735_v25  ;;  %v601_v18 = vadd.s32 4294967245, %v1922_v14 }
  0x28   : > { %vm659_vm12 = vmand %vm645_vm5, %vm657_vm4  ;;  %v2027_v62 = vsel %vm673_vm8, 1.0, %v1735_v25  ;;  %vm625_vm4 = vcmp.ge.s32.totalorder %v623_v0, 0  ;;  %vm898_vm2 = vcmp.lt.s32.totalorder %v1922_v14, 48  ;;  %vm889_vm3 = vcmp.lt.s32.totalorder %v1922_v14, 51 }
  0x29   : > { %v2035_v4 = vsel %vm659_vm12, 1.0, %v1735_v25  ;;  %v2053_v19 = vsel %vm625_vm4, 1.0, %v1735_v25  ;;  %vm603_vm7 = vcmp.ge.s32.totalorder %v601_v18, 0 }
  0x2a   : > { %vm613_vm15 = vmand %vm603_vm7, %vm611_vm10  ;;  %vm964_vm10 = vcmask 588800  }
  0x2b   : > { %v2064_v28 = vsel %vm613_vm15, 1.0, %v1735_v25 }
  0x2f   : > { %1549 = vmatmul.msk.f32.gmra.mxu0 %vm512_vm1, %v495_v36  ;;  %1552 = vmatmul.msk.f32.gmra.mxu1 %vm512_vm1, %v495_v36 }
  0x8d   : > { %v501_v6 = vpop.permute.xlu0 %500 }
  0xa4   : > { %v541_v7 = vpop.f32.mrf.mxu0  ;;  %v564_v8 = vpop.f32.mrf.mxu1 }
  0xa5   : > { %v542_v9 = vadd.f32 %v541_v7, %v501_v6  ;;  %v565_v10 = vadd.f32 %v564_v8, %v501_v6 }
  0xa7   : > { %v1886_v11 = vmax.f32 %v542_v9, 0.0  ;;  %v1888_v12 = vmax.f32 %v565_v10, 0.0 }
  0xa9   : > { %941 = vrot.lane.b32.xlu2 %v1888_v12, %s1727_s20  ;;  %950 = vrot.lane.b32.xlu1 %v1888_v12, %s1728_s24 }
  0xaa   : > { %948 = vrot.lane.b32.xlu0 %v1886_v11, %s1728_s24 }
  0xb1   : > { %930 = vrot.lane.b32.xlu2 %v1886_v11, %s1729_s27  ;;  %939 = vrot.lane.b32.xlu1 %v1886_v11, %s1727_s20 }
  0xb2   : > { %932 = vrot.lane.b32.xlu0 %v1888_v12, %s1729_s27 }
  0xb9   : > { %923 = vrot.lane.b32.xlu2 %v1888_v12, %s2437_s30  ;;  %921 = vrot.lane.b32.xlu1 %v1886_v11, %s2437_s30 }
  0xba   : > { %912 = vrot.lane.b32.xlu0 %v1886_v11, %s1731_s16 }
  0xc1   : > { %903 = vrot.lane.b32.xlu2 %v1886_v11, %s2435_s17  ;;  %914 = vrot.lane.b32.xlu1 %v1888_v12, %s1731_s16 }
  0xc2   : > { %905 = vrot.lane.b32.xlu0 %v1888_v12, %s2435_s17  ;;  %s2450_s17 = smov 45  }
  0xc9   : > { %896 = vrot.lane.b32.xlu2 %v1888_v12, %s2431_s23  ;;  %894 = vrot.lane.b32.xlu1 %v1886_v11, %s2431_s23  ;;  %s2452_s23 = smov 48  }
  0xca   : > { %885 = vrot.lane.b32.xlu0 %v1886_v11, %s2433_s25 }
  0xd1   : > { %887 = vrot.lane.b32.xlu1 %v1888_v12, %s2433_s25  ;;  %961 = vperm.xlu2 %1658, %v958_v51   ;;  %s2451_s25 = smov 51  }
 0x103   : > { %v942_v20 = vpop.permute.xlu2 %941 }
 0x10b   : > { %v931_v31 = vpop.permute.xlu2 %930 }
 0x113   : > { %v924_v48 = vpop.permute.xlu2 %923 }
 0x11b   : > { %v951_v24 = vpop.permute.xlu1 %950  ;;  %v904_v60 = vpop.permute.xlu2 %903 }
 0x11c   : > { %v949_v29 = vpop.permute.xlu0 %948 }
 0x11d   : > { %v953_v32 = vsel %vm952_vm6, %v949_v29, %v951_v24  ;;  %v954_v33 = vsel %vm952_vm6, %v951_v24, %v949_v29 }
 0x11e   : > { %v955_v34 = vmul.f32 %v1952_v26, %v953_v32  ;;  %v956_v35 = vmul.f32 %v1955_v27, %v954_v33 }
 0x120   : > { %975 = vmatpush.msra.mxu2 %v955_v34  ;;  %995 = vmatpush.msra.mxu3 %v956_v35 }
 0x123   : > { %v940_v38 = vpop.permute.xlu1 %939 }
 0x124   : > { %v945_v40 = vsel %vm943_vm11, %v942_v20, %v940_v38  ;;  %v933_v41 = vpop.permute.xlu0 %932  ;;  %v944_v42 = vsel %vm943_vm11, %v940_v38, %v942_v20  ;;  %v897_v20 = vpop.permute.xlu2 %896 }
 0x125   : > { %v935_v44 = vsel %vm934_vm13, %v931_v31, %v933_v41  ;;  %v936_v45 = vsel %vm934_vm13, %v933_v41, %v931_v31  ;;  %976 = vmatpush.msra.mxu2 %v944_v42  ;;  %v947_v46 = vmul.f32 %v1975_v37, %v945_v40 }
 0x126   : > { %v937_v47 = vmul.f32 %v1980_v39, %v935_v44  ;;  %v938_v49 = vmul.f32 %v1987_v43, %v936_v45 }
 0x127   : > { %996 = vmatpush.msra.mxu3 %v947_v46 }
 0x128   : > { %977 = vmatpush.msra.mxu2 %v937_v47  ;;  %v497_v47 = vld [vmem:[%s2447_s2 + $0x8] sm:$0xff] }
 0x129   : > { %997 = vmatpush.msra.mxu3 %v938_v49 }
 0x12b   : > { %v922_v54 = vpop.permute.xlu1 %921 }
 0x12c   : > { %v926_v55 = vsel %vm925_vm0, %v922_v54, %v924_v48  ;;  %v927_v56 = vsel %vm925_vm0, %v924_v48, %v922_v54  ;;  %v913_v57 = vpop.permute.xlu0 %912  ;;  %v962_v38 = vpop.permute.xlu2 %961 }
 0x12d   : > { %v928_v58 = vmul.f32 %v1952_v26, %v926_v55  ;;  %v929_v59 = vmul.f32 %v2004_v52, %v927_v56 }
 0x12f   : > { %978 = vmatpush.msra.mxu2 %v928_v58  ;;  %998 = vmatpush.msra.mxu3 %v929_v59 }
 0x131   : > { %979 = vmatpush.msra.mxu2 %v1886_v11  ;;  %999 = vmatpush.msra.mxu3 %v1888_v12 }
 0x133   : > { %v915_v63 = vpop.permute.xlu1 %914 }
 0x134   : > { %v917_v1 = vsel %vm916_vm9, %v913_v57, %v915_v63  ;;  %v918_v2 = vsel %vm916_vm9, %v915_v63, %v913_v57  ;;  %v906_v3 = vpop.permute.xlu0 %905 }
 0x135   : > { %v908_v6 = vsel %vm907_vm14, %v904_v60, %v906_v3  ;;  %v909_v7 = vsel %vm907_vm14, %v906_v3, %v904_v60  ;;  %v919_v8 = vmul.f32 %v2027_v62, %v918_v2  ;;  %v920_v9 = vmul.f32 %v2023_v61, %v917_v1 }
 0x136   : > { %v910_v10 = vmul.f32 %v2035_v4, %v909_v7  ;;  %v911_v13 = vmul.f32 %v2040_v5, %v908_v6  ;;  %v1075_v6 = vld [vmem:[%s2418_s6] sm:$0xff] }
 0x137   : > { %980 = vmatpush.msra.mxu2 %v919_v8  ;;  %1000 = vmatpush.msra.mxu3 %v920_v9 }
 0x139   : > { %981 = vmatpush.msra.mxu2 %v910_v10  ;;  %1001 = vmatpush.msra.mxu3 %v911_v13 }
 0x13b   : > { %v895_v21 = vpop.permute.xlu1 %894 }
 0x13c   : > { %v900_v22 = vsel %vm898_vm2, %v897_v20, %v895_v21  ;;  %v899_v23 = vsel %vm898_vm2, %v895_v21, %v897_v20  ;;  %v886_v29 = vpop.permute.xlu0 %885 }
 0x13d   : > { %1002 = vmatpush.msra.mxu3 %v899_v23  ;;  %v901_v24 = vmul.f32 %v2053_v19, %v900_v22 }
 0x13f   : > { %982 = vmatpush.msra.mxu2 %v901_v24 }
 0x143   : > { %v888_v31 = vpop.permute.xlu1 %887 }
 0x144   : > { %v890_v32 = vsel %vm889_vm3, %v886_v29, %v888_v31  ;;  %v891_v33 = vsel %vm889_vm3, %v888_v31, %v886_v29 }
 0x145   : > { %v892_v34 = vmul.f32 %v2064_v28, %v891_v33  ;;  %v893_v35 = vmul.f32 %v2023_v61, %v890_v32 }
 0x147   : > { %983 = vmatpush.msra.mxu2 %v892_v34  ;;  %1003 = vmatpush.msra.mxu3 %v893_v35 }
 0x148   : > { %1581 = vmatmul.msk.f32.vlgmr.msra.gmra.mxu2 %vm964_vm10, %v957_v30  ;;  %1582 = vmatmul.msk.f32.vlgmr.msra.gmra.mxu3 %vm964_vm10, %v957_v30 }
 0x1cb   : > { %v985_v40 = vpop.f32.mrf.mxu2  ;;  %v1005_v41 = vpop.f32.mrf.mxu3 }
 0x1cc   : > { %v986_v42 = vadd.f32 %v985_v40, %v962_v38  ;;  %v1006_v44 = vadd.f32 %v1005_v41, %v962_v38 }
 0x1ce   : > { %v2082_v45 = vmax.f32 %v986_v42, 0.0  ;;  %v2084_v46 = vmax.f32 %v1006_v44, 0.0 }
 0x1d0   : > { %1058 = vrot.lane.b32.xlu2 %v2082_v45, %s1727_s20  ;;  %1066 = vrot.lane.b32.xlu0 %v2082_v45, %s1728_s24 }
 0x1d1   : > { %1068 = vrot.lane.b32.xlu1 %v2084_v46, %s1728_s24 }
 0x1d8   : > { %1052 = vrot.lane.b32.xlu2 %v2084_v46, %s1729_s27  ;;  %1060 = vrot.lane.b32.xlu0 %v2084_v46, %s1727_s20 }
 0x1d9   : > { %1050 = vrot.lane.b32.xlu1 %v2082_v45, %s1729_s27 }
 0x1e0   : > { %1034 = vrot.lane.b32.xlu2 %v2082_v45, %s1731_s16  ;;  %1042 = vrot.lane.b32.xlu0 %v2082_v45, %s2437_s30 }
 0x1e1   : > { %1044 = vrot.lane.b32.xlu1 %v2084_v46, %s2437_s30  ;;  %s2453_s30 = smov 125  }
 0x1e8   : > { %1028 = vrot.lane.b32.xlu2 %v2084_v46, %s2450_s17  ;;  %1036 = vrot.lane.b32.xlu0 %v2084_v46, %s1731_s16 }
 0x1e9   : > { %1026 = vrot.lane.b32.xlu1 %v2082_v45, %s2450_s17 }
 0x1f0   : > { %1010 = vrot.lane.b32.xlu2 %v2082_v45, %s2451_s25  ;;  %1018 = vrot.lane.b32.xlu0 %v2082_v45, %s2452_s23 }
 0x1f1   : > { %1020 = vrot.lane.b32.xlu1 %v2084_v46, %s2452_s23 }
 0x1f8   : > { %505 = vperm.xlu2 %1658, %v497_v47   ;;  %1012 = vrot.lane.b32.xlu0 %v2084_v46, %s2451_s25 }
 0x1f9   : > { %1078 = vperm.xlu1 %1659, %v1075_v6  }
 0x22a   : > { %v1059_v48 = vpop.permute.xlu2 %1058 }
 0x232   : > { %v1053_v56 = vpop.permute.xlu2 %1052 }
 0x23a   : > { %v1035_v7 = vpop.permute.xlu2 %1034 }
 0x242   : > { %v1067_v49 = vpop.permute.xlu0 %1066  ;;  %v1029_v22 = vpop.permute.xlu2 %1028 }
 0x243   : > { %v1069_v50 = vpop.permute.xlu1 %1068 }
 0x244   : > { %v1070_v51 = vsel %vm952_vm6, %v1067_v49, %v1069_v50  ;;  %v1071_v53 = vsel %vm952_vm6, %v1069_v50, %v1067_v49 }
 0x245   : > { %v1072_v54 = vmul.f32 %v1952_v26, %v1070_v51  ;;  %v1073_v55 = vmul.f32 %v1955_v27, %v1071_v53  ;;  %v1074_v53 = vld [vmem:[%s2417_s5] sm:$0xff] }
 0x247   : > { %1091 = vmatpush.msrb.mxu0 %v1072_v54  ;;  %1111 = vmatpush.msrb.mxu1 %v1073_v55  ;;  %v544_v54 = vpop.f32.mrf.mxu0  ;;  %v567_v55 = vpop.f32.mrf.mxu1 }
 0x24a   : > { %v1061_v57 = vpop.permute.xlu0 %1060  ;;  %v1011_v44 = vpop.permute.xlu2 %1010 }
 0x24b   : > { %v1063_v58 = vsel %vm943_vm11, %v1061_v57, %v1059_v48  ;;  %v1051_v59 = vpop.permute.xlu1 %1050  ;;  %v1062_v60 = vsel %vm943_vm11, %v1059_v48, %v1061_v57 }
 0x24c   : > { %v1054_v63 = vsel %vm934_vm13, %v1051_v59, %v1053_v56  ;;  %v1055_v0 = vsel %vm934_vm13, %v1053_v56, %v1051_v59  ;;  %1092 = vmatpush.msrb.mxu0 %v1062_v60  ;;  %v1065_v1 = vmul.f32 %v1975_v37, %v1063_v58 }
 0x24d   : > { %v1056_v2 = vmul.f32 %v1980_v39, %v1054_v63  ;;  %v1057_v3 = vmul.f32 %v1987_v43, %v1055_v0 }
 0x24e   : > { %1112 = vmatpush.msrb.mxu1 %v1065_v1  ;;  %v1191_v1 = vld [vmem:[%s2420_s8] sm:$0xff] }
 0x24f   : > { %1093 = vmatpush.msrb.mxu0 %v1056_v2  ;;  %v1286_v2 = vld [vmem:[%s2424_s12] sm:$0xff] }
 0x250   : > { %1113 = vmatpush.msrb.mxu1 %v1057_v3  ;;  %v1254_v3 = vld [vmem:[%s2422_s10] sm:$0xff] }
 0x252   : > { %v1043_v8 = vpop.permute.xlu0 %1042  ;;  %v506_v6 = vpop.permute.xlu2 %505 }
 0x253   : > { %v1045_v9 = vpop.permute.xlu1 %1044 }
 0x254   : > { %v1046_v10 = vsel %vm925_vm0, %v1043_v8, %v1045_v9  ;;  %v1047_v13 = vsel %vm925_vm0, %v1045_v9, %v1043_v8  ;;  %v568_v8 = vadd.f32 %v567_v55, %v506_v6 }
 0x255   : > { %v1048_v18 = vmul.f32 %v1952_v26, %v1046_v10  ;;  %v1049_v20 = vmul.f32 %v2004_v52, %v1047_v13 }
 0x256   : > { %v573_v10 = vmax.f32 %v568_v8, 0.0  ;;  %v1190_v8 = vld [vmem:[%s2419_s7] sm:$0xff] }
 0x257   : > { %1094 = vmatpush.msrb.mxu0 %v1048_v18  ;;  %1114 = vmatpush.msrb.mxu1 %v1049_v20 }
 0x259   : > { %1095 = vmatpush.msrb.mxu0 %v2082_v45  ;;  %1115 = vmatpush.msrb.mxu1 %v2084_v46 }
 0x25a   : > { %v1037_v21 = vpop.permute.xlu0 %1036 }
 0x25b   : > { %v1038_v23 = vsel %vm916_vm9, %v1035_v7, %v1037_v21  ;;  %v1039_v24 = vsel %vm916_vm9, %v1037_v21, %v1035_v7  ;;  %v1027_v29 = vpop.permute.xlu1 %1026  ;;  %v545_v7 = vadd.f32 %v544_v54, %v506_v6 }
 0x25c   : > { %v1030_v31 = vsel %vm907_vm14, %v1027_v29, %v1029_v22  ;;  %v1031_v32 = vsel %vm907_vm14, %v1029_v22, %v1027_v29  ;;  %v1040_v33 = vmul.f32 %v2027_v62, %v1039_v24  ;;  %v1041_v34 = vmul.f32 %v2023_v61, %v1038_v23 }
 0x25d   : > { %v1032_v35 = vmul.f32 %v2035_v4, %v1031_v32  ;;  %v1033_v30 = vmul.f32 %v2040_v5, %v1030_v31  ;;  %v572_v9 = vmax.f32 %v545_v7, 0.0 }
 0x25e   : > { %1096 = vmatpush.msrb.mxu0 %v1040_v33  ;;  %1116 = vmatpush.msrb.mxu1 %v1041_v34 }
 0x25f   : > { %v1242_v13 = vadd.f32 %v573_v10, %v572_v9 }
 0x260   : > { %1097 = vmatpush.msrb.mxu0 %v1032_v35  ;;  %1117 = vmatpush.msrb.mxu1 %v1033_v30 }
 0x262   : > { %v1019_v36 = vpop.permute.xlu0 %1018 }
 0x263   : > { %v1021_v38 = vpop.permute.xlu1 %1020 }
 0x264   : > { %v1023_v40 = vsel %vm898_vm2, %v1021_v38, %v1019_v36  ;;  %v1022_v41 = vsel %vm898_vm2, %v1019_v36, %v1021_v38 }
 0x265   : > { %1118 = vmatpush.msrb.mxu1 %v1022_v41  ;;  %v1024_v42 = vmul.f32 %v2053_v19, %v1023_v40 }
 0x267   : > { %1098 = vmatpush.msrb.mxu0 %v1024_v42 }
 0x26a   : > { %v1013_v47 = vpop.permute.xlu0 %1012 }
 0x26b   : > { %v1014_v48 = vsel %vm889_vm3, %v1011_v44, %v1013_v47  ;;  %v1015_v49 = vsel %vm889_vm3, %v1013_v47, %v1011_v44  ;;  %v1079_v56 = vpop.permute.xlu1 %1078 }
 0x26c   : > { %v1016_v50 = vmul.f32 %v2064_v28, %v1015_v49  ;;  %v1017_v51 = vmul.f32 %v2023_v61, %v1014_v48 }
 0x26e   : > { %1099 = vmatpush.msrb.mxu0 %v1016_v50  ;;  %1119 = vmatpush.msrb.mxu1 %v1017_v51 }
 0x26f   : > { %1583 = vmatmul.msk.f32.vlgmr.msrb.gmra.mxu0 %vm964_vm10, %v1074_v53  ;;  %1584 = vmatmul.msk.f32.vlgmr.msrb.gmra.mxu1 %vm964_vm10, %v1074_v53 }
 0x2ec   : > { %v1101_v57 = vpop.f32.mrf.mxu0  ;;  %v1121_v58 = vpop.f32.mrf.mxu1 }
 0x2ed   : > { %v1102_v59 = vadd.f32 %v1101_v57, %v1079_v56  ;;  %v1122_v60 = vadd.f32 %v1121_v58, %v1079_v56 }
 0x2ef   : > { %v2177_v63 = vmax.f32 %v1102_v59, 0.0  ;;  %v2179_v0 = vmax.f32 %v1122_v60, 0.0 }
 0x2f1   : > { %1184 = vrot.lane.b32.xlu1 %v2179_v0, %s1728_s24  ;;  %1174 = vrot.lane.b32.xlu2 %v2177_v63, %s1727_s20 }
 0x2f2   : > { %1182 = vrot.lane.b32.xlu0 %v2177_v63, %s1728_s24  ;;  %s1744_s24 = smov 17  }
 0x2f9   : > { %1166 = vrot.lane.b32.xlu1 %v2177_v63, %s1729_s27  ;;  %1168 = vrot.lane.b32.xlu2 %v2179_v0, %s1729_s27 }
 0x2fa   : > { %1176 = vrot.lane.b32.xlu0 %v2179_v0, %s1727_s20  ;;  %s1743_s20 = smov 15  }
 0x301   : > { %1160 = vrot.lane.b32.xlu1 %v2179_v0, %s2453_s30  ;;  %1150 = vrot.lane.b32.xlu2 %v2177_v63, %s1731_s16 }
 0x302   : > { %1158 = vrot.lane.b32.xlu0 %v2177_v63, %s2453_s30  ;;  %s1742_s30 = smov 127  }
 0x309   : > { %1142 = vrot.lane.b32.xlu1 %v2177_v63, %s2450_s17  ;;  %1144 = vrot.lane.b32.xlu2 %v2179_v0, %s2450_s17  ;;  %s1737_s17 = smov 111  }
 0x30a   : > { %1152 = vrot.lane.b32.xlu0 %v2179_v0, %s1731_s16  ;;  %s1738_s16 = smov 1  }
 0x311   : > { %1136 = vrot.lane.b32.xlu1 %v2179_v0, %s2452_s23  ;;  %1126 = vrot.lane.b32.xlu2 %v2177_v63, %s2451_s25 }
 0x312   : > { %1134 = vrot.lane.b32.xlu0 %v2177_v63, %s2452_s23  ;;  %s1741_s23 = smov 113  }
 0x319   : > { %1194 = vperm.xlu2 %1658, %v1191_v1  }
 0x31a   : > { %1128 = vrot.lane.b32.xlu0 %v2179_v0, %s2451_s25  ;;  %s1740_s25 = smov 16  }
 0x321   : > { %1289 = vperm.xlu2 %1658, %v1286_v2  }
 0x322   : > { %1257 = vperm.xlu0 %1657, %v1254_v3  }
 0x33b   : > { %1243 = vadd.xlane.f32.xlu1 %v1242_v13 }
 0x34b   : > { %v1175_v18 = vpop.permute.xlu2 %1174 }
 0x353   : > { %v1169_v31 = vpop.permute.xlu2 %1168 }
 0x35b   : > { %v1151_v41 = vpop.permute.xlu2 %1150 }
 0x363   : > { %v1185_v20 = vpop.permute.xlu1 %1184 }
 0x364   : > { %v1183_v21 = vpop.permute.xlu0 %1182 }
 0x365   : > { %v1186_v22 = vsel %vm952_vm6, %v1183_v21, %v1185_v20  ;;  %v1187_v23 = vsel %vm952_vm6, %v1185_v20, %v1183_v21  ;;  %vm1260_vm6 = vcmask 64512  }
 0x366   : > { %v1188_v24 = vmul.f32 %v1952_v26, %v1186_v22  ;;  %v1189_v29 = vmul.f32 %v1955_v27, %v1187_v23  ;;  %v1253_v22 = vld [vmem:[%s2421_s9] sm:$0xff] }
 0x368   : > { %1207 = vmatpush.msrb.mxu2 %v1188_v24  ;;  %1227 = vmatpush.msrb.mxu3 %v1189_v29 }
 0x36b   : > { %v1167_v32 = vpop.permute.xlu1 %1166 }
 0x36c   : > { %v1170_v33 = vsel %vm934_vm13, %v1167_v32, %v1169_v31  ;;  %v1177_v34 = vpop.permute.xlu0 %1176  ;;  %v1171_v35 = vsel %vm934_vm13, %v1169_v31, %v1167_v32 }
 0x36d   : > { %v1179_v30 = vsel %vm943_vm11, %v1177_v34, %v1175_v18  ;;  %v1178_v36 = vsel %vm943_vm11, %v1175_v18, %v1177_v34  ;;  %v1172_v38 = vmul.f32 %v1980_v39, %v1170_v33  ;;  %v1173_v40 = vmul.f32 %v1987_v43, %v1171_v35  ;;  %v1145_v43 = vpop.permute.xlu2 %1144 }
 0x36e   : > { %1208 = vmatpush.msrb.mxu2 %v1178_v36  ;;  %v1181_v27 = vmul.f32 %v1975_v37, %v1179_v30  ;;  %vm1292_vm11 = vcmask 326656  }
 0x370   : > { %1209 = vmatpush.msrb.mxu2 %v1172_v38  ;;  %1228 = vmatpush.msrb.mxu3 %v1181_v27  ;;  %v1285_v27 = vld [vmem:[%s2423_s11] sm:$0xff] }
 0x372   : > { %1229 = vmatpush.msrb.mxu3 %v1173_v40 }
 0x373   : > { %v1161_v42 = vpop.permute.xlu1 %1160 }
 0x374   : > { %v1159_v44 = vpop.permute.xlu0 %1158 }
 0x375   : > { %v1162_v47 = vsel %vm925_vm0, %v1159_v44, %v1161_v42  ;;  %v1163_v48 = vsel %vm925_vm0, %v1161_v42, %v1159_v44  ;;  %v1127_v2 = vpop.permute.xlu2 %1126 }
 0x376   : > { %v1164_v49 = vmul.f32 %v1952_v26, %v1162_v47  ;;  %v1165_v39 = vmul.f32 %v2004_v52, %v1163_v48  ;;  %v2311_v47 = vadd.s32 1, %v1928_v16  ;;  %v870_v48 = vadd.s32 17, %v1925_v15 }
 0x378   : > { %1210 = vmatpush.msrb.mxu2 %v1164_v49  ;;  %1230 = vmatpush.msrb.mxu3 %v1165_v39  ;;  %v2315_v49 = vadd.s32 1, %v1931_v17  ;;  %vm798_vm13 = vcmp.lt.s32.totalorder %v2311_v47, 16  ;;  %vm874_vm0 = vcmp.lt.s32.totalorder %v870_v48, 256 }
 0x379   : > { %vm880_vm8 = vmand %vm874_vm0, %vm798_vm13 }
 0x37a   : > { %1211 = vmatpush.msrb.mxu2 %v2177_v63  ;;  %1231 = vmatpush.msrb.mxu3 %v2179_v0  ;;  %vm797_vm5 = vcmp.lt.s32.totalorder %v2315_v49, 16 }
 0x37b   : > { %v1143_v37 = vpop.permute.xlu1 %1142 }
 0x37c   : > { %v1153_v50 = vpop.permute.xlu0 %1152  ;;  %v1146_v51 = vsel %vm907_vm14, %v1143_v37, %v1145_v43  ;;  %v1147_v53 = vsel %vm907_vm14, %v1145_v43, %v1143_v37  ;;  %v1574_v37 = vsel %vm797_vm5, 1.0, %v1735_v25  ;;  %v1580_v43 = vsel %vm880_vm8, 1.0, %v1735_v25 }
 0x37d   : > { %v1154_v26 = vsel %vm916_vm9, %v1151_v41, %v1153_v50  ;;  %v1155_v52 = vsel %vm916_vm9, %v1153_v50, %v1151_v41  ;;  %v1148_v56 = vmul.f32 %v2035_v4, %v1147_v53  ;;  %v1149_v57 = vmul.f32 %v2040_v5, %v1146_v51  ;;  %v1195_v23 = vpop.permute.xlu2 %1194  ;;  %v1411_v41 = vld [vmem:[%s2426_s14] sm:$0xff] }
 0x37e   : > { %v1156_v54 = vmul.f32 %v2027_v62, %v1155_v52  ;;  %v1157_v55 = vmul.f32 %v2023_v61, %v1154_v26  ;;  %vm1405_vm9 = vcmp.lt.s32.totalorder %v1922_v14, 111  ;;  %v854_v51 = vadd.s32 16, %v1925_v15 }
 0x37f   : > { %vm1396_vm14 = vcmp.lt.s32.totalorder %v1922_v14, 112 }
 0x380   : > { %1212 = vmatpush.msrb.mxu2 %v1156_v54  ;;  %1232 = vmatpush.msrb.mxu3 %v1157_v55  ;;  %vm858_vm12 = vcmp.lt.s32.totalorder %v854_v51, 256  ;;  %v754_v55 = vadd.s32 4294967295, %v1928_v16  ;;  %v822_v16 = vadd.s32 1, %v1925_v15 }
 0x382   : > { %1213 = vmatpush.msrb.mxu2 %v1148_v56  ;;  %1233 = vmatpush.msrb.mxu3 %v1149_v57  ;;  %v838_v56 = vadd.s32 15, %v1925_v15  ;;  %v1578_v57 = vsel %vm858_vm12, 1.0, %v1735_v25  ;;  %vm756_vm4 = vcmp.ge.s32.totalorder %v754_v55, 0  ;;  %v805_v15 = vadd.s32 4294967295, %v1922_v14 }
 0x383   : > { %v1137_v58 = vpop.permute.xlu1 %1136 }
 0x384   : > { %v1135_v59 = vpop.permute.xlu0 %1134  ;;  %vm807_vm0 = vcmp.ge.s32.totalorder %v805_v15, 0 }
 0x385   : > { %v1139_v60 = vsel %vm898_vm2, %v1137_v58, %v1135_v59  ;;  %v1138_v1 = vsel %vm898_vm2, %v1135_v59, %v1137_v58  ;;  %vm842_vm2 = vcmp.lt.s32.totalorder %v838_v56, 256 }
 0x386   : > { %1234 = vmatpush.msrb.mxu3 %v1138_v1  ;;  %v1140_v62 = vmul.f32 %v2053_v19, %v1139_v60  ;;  %v1736_v19 = vmov 256.0   ;;  %v2332_v60 = vadd.s32 4294967295, %v1931_v17  ;;  %vm846_vm15 = vmand %vm842_vm2, %vm756_vm4 }
 0x387   : > { %1660 = vrcp.f32 %v1736_v19 }
 0x388   : > { %1214 = vmatpush.msrb.mxu2 %v1140_v62  ;;  %vm755_vm7 = vcmp.ge.s32.totalorder %v2332_v60, 0 }
 0x389   : > { %v1576_v17 = vsel %vm755_vm7, 1.0, %v1735_v25  ;;  %vm813_vm8 = vmand %vm807_vm0, %vm755_vm7 }
 0x38c   : > { %v1129_v3 = vpop.permute.xlu0 %1128 }
 0x38d   : > { %v1130_v4 = vsel %vm889_vm3, %v1127_v2, %v1129_v3  ;;  %v1131_v5 = vsel %vm889_vm3, %v1129_v3, %v1127_v2  ;;  %v1661_v9 = vpop.eup %1660  ;;  %vm1387_vm3 = vcmp.lt.s32.totalorder %v1922_v14, 113  ;;  %v1577_v3 = vsel %vm846_vm15, 1.0, %v1735_v25 }
 0x38e   : > { %v1132_v6 = vmul.f32 %v2064_v28, %v1131_v5  ;;  %v1133_v7 = vmul.f32 %v2023_v61, %v1130_v4  ;;  %v1246_v10 = vmul.f32 256.0, %v1661_v9  ;;  %vm1250_vm1 = vweird.f32 %v1661_v9 }
 0x38f   : > { %vm1360_vm15 = vcmp.lt.s32.totalorder %v1922_v14, 15 }
 0x390   : > { %1215 = vmatpush.msrb.mxu2 %v1132_v6  ;;  %1235 = vmatpush.msrb.mxu3 %v1133_v7  ;;  %v1247_v13 = vsub.f32 1.0, %v1246_v10 }
 0x391   : > { %1585 = vmatmul.msk.f32.vlgmr.msrb.gmra.mxu2 %vm964_vm10, %v1190_v8  ;;  %1586 = vmatmul.msk.f32.vlgmr.msrb.gmra.mxu3 %vm964_vm10, %v1190_v8 }
 0x392   : > { %v1248_v18 = vmul.f32 %v1661_v9, %v1247_v13 }
 0x394   : > { %v1249_v20 = vadd.f32 %v1661_v9, %v1248_v18  ;;  %v1258_v35 = vpop.permute.xlu0 %1257 }
 0x396   : > { %v1251_v28 = vsel %vm1250_vm1, %v1661_v9, %v1249_v20  ;;  %vm826_vm1 = vcmp.lt.s32.totalorder %v822_v16, 256 }
 0x3ae   : > { %v1244_v61 = vpop.xlane.xlu1 %1243 }
 0x3af   : > { %v1252_v21 = vmul.f32 %v1251_v28, %v1244_v61 }
 0x3b1   : > { %1279 = vmatpush.msra.mxu0 %v1252_v21  ;;  %v783_v21 = vadd.s32 4294967281, %v1922_v14 }
 0x3b2   : > { %1587 = vmatmul.msk.f32.vlgmr.msra.gmra.mxu0 %vm1260_vm6, %v1253_v22  ;;  %vm832_vm6 = vmand %vm826_vm1, %vm798_vm13 }
 0x3b3   : > { %v1575_v9 = vsel %vm832_vm6, 1.0, %v1735_v25  ;;  %vm785_vm12 = vcmp.ge.s32.totalorder %v783_v21, 0 }
 0x414   : > { %v1217_v24 = vpop.f32.mrf.mxu2  ;;  %v1237_v29 = vpop.f32.mrf.mxu3 }
 0x415   : > { %v1218_v31 = vadd.f32 %v1217_v24, %v1195_v23  ;;  %v1238_v32 = vadd.f32 %v1237_v29, %v1195_v23  ;;  %v1568_v23 = vsel %vm756_vm4, 1.0, %v1735_v25  ;;  %v1572_v24 = vsel %vm813_vm8, 1.0, %v1735_v25 }
 0x416   : > { %vm1351_vm4 = vcmp.lt.s32.totalorder %v1922_v14, 16 }
 0x417   : > { %v1240_v33 = vmax.f32 %v1218_v31, 0.0  ;;  %v1241_v34 = vmax.f32 %v1238_v32, 0.0  ;;  %v767_v31 = vadd.s32 4294967280, %v1922_v14 }
 0x419   : > { %1307 = vmatpush.msra.mxu1 %v1240_v33  ;;  %1327 = vmatpush.msrb.mxu0 %v1241_v34  ;;  %vm769_vm2 = vcmp.ge.s32.totalorder %v767_v31, 0 }
 0x41b   : > { %1308 = vmatpush.msra.mxu1 %v2177_v63  ;;  %1328 = vmatpush.msrb.mxu0 %v2179_v0 }
 0x41d   : > { %1309 = vmatpush.msra.mxu1 %v2082_v45  ;;  %1329 = vmatpush.msrb.mxu0 %v2084_v46  ;;  %v1290_v45 = vpop.permute.xlu2 %1289 }
 0x41f   : > { %1310 = vmatpush.msra.mxu1 %v1886_v11  ;;  %1330 = vmatpush.msrb.mxu0 %v1888_v12 }
 0x42f   : > { %v1281_v30 = vpop.f32.mrf.mxu0 }
 0x430   : > { %v1282_v36 = vadd.f32 %v1281_v30, %v1258_v35  ;;  %v745_v30 = vadd.s32 4294967279, %v1922_v14 }
 0x432   : > { %v1284_v38 = vmax.f32 %v1282_v36, 0.0 }
 0x434   : > { %1311 = vmatpush.msra.mxu1 %v1284_v38  ;;  %1331 = vmatpush.msrb.mxu0 %v1284_v38 }
 0x435   : > { %1588 = vmatmul.msk.f32.vlgmr.msra.gmra.mxu1 %vm1292_vm11, %v1285_v27  ;;  %1589 = vmatmul.msk.f32.vlgmr.msrb.gmra.mxu0 %vm1292_vm11, %v1285_v27  ;;  %vm1378_vm11 = vcmp.lt.s32.totalorder %v1922_v14, 127  ;;  %v1571_v27 = vsel %vm798_vm13, 1.0, %v1735_v25  ;;  %vm1342_vm13 = vcmp.lt.s32.totalorder %v1922_v14, 17 }
 0x4b2   : > { %v1313_v63 = vpop.f32.mrf.mxu1  ;;  %v1333_v46 = vpop.f32.mrf.mxu0 }
 0x4b3   : > { %v1314_v0 = vadd.f32 %v1313_v63, %v1290_v45  ;;  %v1334_v11 = vadd.f32 %v1333_v46, %v1290_v45  ;;  %v1569_v63 = vsel %vm769_vm2, 1.0, %v1735_v25 }
 0x4b5   : > { %v2287_v40 = vmax.f32 %v1314_v0, 0.0  ;;  %v2289_v12 = vmax.f32 %v1334_v11, 0.0 }
 0x4b7   : > { %1403 = vrot.lane.b32.xlu2 %v2289_v12, %s1737_s17  ;;  %1365 = vrot.lane.b32.xlu1 %v2287_v40, %s1738_s16 }
 0x4b8   : > { %1401 = vrot.lane.b32.xlu0 %v2287_v40, %s1737_s17 }
 0x4bf   : > { %1394 = vrot.lane.b32.xlu2 %v2289_v12, %s1739_s26  ;;  %1349 = vrot.lane.b32.xlu1 %v2289_v12, %s1740_s25 }
 0x4c0   : > { %1392 = vrot.lane.b32.xlu0 %v2287_v40, %s1739_s26 }
 0x4c7   : > { %1385 = vrot.lane.b32.xlu2 %v2289_v12, %s1741_s23 }
 0x4c8   : > { %1383 = vrot.lane.b32.xlu0 %v2287_v40, %s1741_s23 }
 0x4cf   : > { %1376 = vrot.lane.b32.xlu2 %v2289_v12, %s1742_s30 }
 0x4d0   : > { %1374 = vrot.lane.b32.xlu0 %v2287_v40, %s1742_s30  ;;  %s1598_s30 = sshll.u32 %s1846_s22, 4 }
 0x4d1   : > { %s1476_s27 = scalar_lea.hbm %s2427_s15, %s1598_s30 }
 0x4d2   : > { %s1480_s26 = sshll.u32 %s1476_s27, 4  ;;  %s1481_s26 = int_to_ptr.hbm [resolvable:$true] %s1480_s26 }
 0x4d3   : > { %s1676_s1 = sshra.s32 %s1481_s26, 4  ;;  %s1677_s1 = int_to_ptr.hbm [resolvable:$true] %s1676_s1 }
 0x4d4   : > { %s1678_s22 = scalar_lea.hbm %s1677_s1, 16  ;;  %p1683_p0 = scmp.lt.s32.totalorder %s1677_s1, %s2427_s15 }
 0x4d5   : > { %p1679_p11 = scmp.ne.s32.totalorder %s1677_s1, %s1678_s22 }
 0x4d7   : > { %1356 = vrot.lane.b32.xlu2 %v2287_v40, %s1743_s20  ;;  %p1680_p12 = pnand %p1679_p11, %p1863_p5 }
 0x4d8   : > { %1367 = vrot.lane.b32.xlu0 %v2289_v12, %s1738_s16 }
 0x4d9   : > { %p1681_p13 = pneg %p1680_p12 }
 0x4df   : > { %1338 = vrot.lane.b32.xlu2 %v2287_v40, %s1744_s24 }
 0x4e0   : > { %1358 = vrot.lane.b32.xlu0 %v2289_v12, %s1743_s20 }
 0x4e7   : > { %1347 = vrot.lane.b32.xlu2 %v2287_v40, %s1740_s25  ;;  %s485_s25 = sand.u32 1, %s1716_s19  }
 0x4e8   : > { %1340 = vrot.lane.b32.xlu0 %v2289_v12, %s1744_s24  ;;  %s1544_s23 = sshll.u32 %s485_s25, 4  ;;  %s1465_s0 = scalar_lea.sflag [#allocation3], %s485_s25 }
 0x4e9   : > { %s487_s17 = scalar_lea.vmem [#allocation2], %s1544_s23  ;;  %s1682_s23 = scalar_lea.hbm %s2427_s15, 32 }
 0x4ea   : > { %s1478_s16 = sshll.u32 %s487_s17, 4  ;;  %p1684_p1 = scmp.lt.s32.totalorder %s1682_s23, %s1678_s22  ;;  %s1479_s16 = int_to_ptr.vmem [resolvable:$true] %s1478_s16 }
 0x4ec   : > { %p1685_p2 = por %p1684_p1, %p1683_p0 }
 0x4ee   : > { %p1686_p3 = pnand %p1685_p2, %p1681_p13 }
 0x4f0   : > { %1414 = vperm.xlu0 %1657, %v1411_v41  }
 0x511   : > { %v1404_v42 = vpop.permute.xlu2 %1403 }
 0x519   : > { %v1395_v44 = vpop.permute.xlu2 %1394 }
 0x521   : > { %v1386_v39 = vpop.permute.xlu2 %1385 }
 0x529   : > { %v1377_v58 = vpop.permute.xlu2 %1376  ;;  %v1366_v22 = vpop.permute.xlu1 %1365 }
 0x52a   : > { %v1402_v50 = vpop.permute.xlu0 %1401 }
 0x52b   : > { %v1406_v53 = vsel %vm1405_vm9, %v1402_v50, %v1404_v42  ;;  %v1407_v26 = vsel %vm1405_vm9, %v1404_v42, %v1402_v50  ;;  %vm1369_vm9 = vcmp.lt.s32.totalorder %v1922_v14, 1  ;;  %v1410_v50 = vld [vmem:[%s2425_s13] sm:$0xff] }
 0x52c   : > { %v1408_v52 = vmul.f32 %v1574_v37, %v1406_v53  ;;  %v1409_v54 = vmul.f32 %v1580_v43, %v1407_v26 }
 0x52e   : > { %1427 = vmatpush.msrb.mxu1 %v1408_v52  ;;  %1447 = vmatpush.msra.mxu2 %v1409_v54 }
 0x531   : > { %v1357_v7 = vpop.permute.xlu2 %1356  ;;  %v1350_v45 = vpop.permute.xlu1 %1349 }
 0x532   : > { %v1393_v59 = vpop.permute.xlu0 %1392 }
 0x533   : > { %v1398_v1 = vsel %vm1396_vm14, %v1395_v44, %v1393_v59  ;;  %v1397_v62 = vsel %vm1396_vm14, %v1393_v59, %v1395_v44  ;;  %vm799_vm14 = vmand %vm785_vm12, %vm797_vm5  ;;  %vm747_vm5 = vcmp.ge.s32.totalorder %v745_v30, 0 }
 0x534   : > { %v1400_v2 = vmul.f32 %v1578_v57, %v1398_v1  ;;  %1428 = vmatpush.msrb.mxu1 %v1397_v62  ;;  %v1570_v38 = vsel %vm799_vm14, 1.0, %v1735_v25 }
 0x536   : > { %1448 = vmatpush.msra.mxu2 %v1400_v2 }
 0x539   : > { %v1339_v61 = vpop.permute.xlu2 %1338 }
 0x53a   : > { %v1384_v4 = vpop.permute.xlu0 %1383 }
 0x53b   : > { %v1388_v5 = vsel %vm1387_vm3, %v1384_v4, %v1386_v39  ;;  %v1389_v6 = vsel %vm1387_vm3, %v1386_v39, %v1384_v4  ;;  %vm757_vm3 = vmand %vm747_vm5, %vm755_vm7 }
 0x53c   : > { %v1390_v8 = vmul.f32 %v1576_v17, %v1388_v5  ;;  %v1391_v19 = vmul.f32 %v1577_v3, %v1389_v6  ;;  %v1567_v47 = vsel %vm757_vm3, 1.0, %v1735_v25 }
 0x53e   : > { %1429 = vmatpush.msrb.mxu1 %v1390_v8  ;;  %1449 = vmatpush.msra.mxu2 %v1391_v19 }
 0x541   : > { %v1348_v36 = vpop.permute.xlu2 %1347 }
 0x542   : > { %v1375_v10 = vpop.permute.xlu0 %1374  ;;  %v1353_v0 = vsel %vm1351_vm4, %v1350_v45, %v1348_v36  ;;  %v1352_v44 = vsel %vm1351_vm4, %v1348_v36, %v1350_v45 }
 0x543   : > { %v1379_v13 = vsel %vm1378_vm11, %v1375_v10, %v1377_v58  ;;  %v1380_v18 = vsel %vm1378_vm11, %v1377_v58, %v1375_v10  ;;  %v1354_v42 = vmul.f32 %v1569_v63, %v1353_v0 }
 0x544   : > { %v1381_v20 = vmul.f32 %v1574_v37, %v1379_v13  ;;  %v1382_v28 = vmul.f32 %v1575_v9, %v1380_v18 }
 0x546   : > { %1430 = vmatpush.msrb.mxu1 %v1381_v20  ;;  %1450 = vmatpush.msra.mxu2 %v1382_v28 }
 0x548   : > { %1431 = vmatpush.msrb.mxu1 %v2287_v40  ;;  %1451 = vmatpush.msra.mxu2 %v2289_v12 }
 0x54a   : > { %v1368_v29 = vpop.permute.xlu0 %1367 }
 0x54b   : > { %v1370_v32 = vsel %vm1369_vm9, %v1366_v22, %v1368_v29  ;;  %v1371_v33 = vsel %vm1369_vm9, %v1368_v29, %v1366_v22 }
 0x54c   : > { %v1372_v34 = vmul.f32 %v1572_v24, %v1371_v33  ;;  %v1373_v35 = vmul.f32 %v1568_v23, %v1370_v32 }
 0x54e   : > { %1432 = vmatpush.msrb.mxu1 %v1372_v34  ;;  %1452 = vmatpush.msra.mxu2 %v1373_v35 }
 0x552   : > { %v1359_v46 = vpop.permute.xlu0 %1358 }
 0x553   : > { %v1361_v11 = vsel %vm1360_vm15, %v1357_v7, %v1359_v46  ;;  %v1362_v40 = vsel %vm1360_vm15, %v1359_v46, %v1357_v7 }
 0x554   : > { %v1363_v12 = vmul.f32 %v1570_v38, %v1362_v40  ;;  %v1364_v41 = vmul.f32 %v1571_v27, %v1361_v11 }
 0x556   : > { %1433 = vmatpush.msrb.mxu1 %v1363_v12  ;;  %1453 = vmatpush.msra.mxu2 %v1364_v41 }
 0x558   : > { %1434 = vmatpush.msrb.mxu1 %v1354_v42  ;;  %1454 = vmatpush.msra.mxu2 %v1352_v44 }
 0x55a   : > { %v1341_v48 = vpop.permute.xlu0 %1340 }
 0x55b   : > { %v1343_v49 = vsel %vm1342_vm13, %v1339_v61, %v1341_v48  ;;  %v1344_v39 = vsel %vm1342_vm13, %v1341_v48, %v1339_v61 }
 0x55c   : > { %v1345_v37 = vmul.f32 %v1567_v47, %v1344_v39  ;;  %v1346_v43 = vmul.f32 %v1568_v23, %v1343_v49 }
 0x55e   : > { %1435 = vmatpush.msrb.mxu1 %v1345_v37  ;;  %1455 = vmatpush.msra.mxu2 %v1346_v43 }
 0x55f   : > { %1590 = vmatmul.msk.f32.vlgmr.msrb.gmra.mxu1 %vm964_vm10, %v1410_v50  ;;  %1591 = vmatmul.msk.f32.vlgmr.msra.gmra.mxu2 %vm964_vm10, %v1410_v50 }
 0x562   : > { %v1415_v14 = vpop.permute.xlu0 %1414 }
 0x5dc   : > { %v1437_v51 = vpop.f32.mrf.mxu1 }
 0x5dd   : > { %v1438_v25 = vadd.f32 %v1437_v51, %v1415_v14 }
 0x5df   : > { %v1460_v53 = vmax.f32 %v1438_v25, 0.0 }
 0x5e1   : > { %1462 = vst [vmem:[%s487_s17] sm:$0xff] %v1460_v53 }
 0x5e2   : > { %v1457_v26 = vpop.f32.mrf.mxu2 }
 0x5e3   : > { %v1458_v52 = vadd.f32 %v1457_v26, %v1415_v14 }
 0x5e5   : > { %v1461_v54 = vmax.f32 %v1458_v52, 0.0 }
 0x5e7   : > { %1463 = vst [vmem:[%s487_s17 + $0x8] sm:$0xff] %v1461_v54 }
 0x5e8   : > { %1689 = shalt.err (!%p1686_p3)
}
 0x5e9   : > { %1599 = dma.vmem_to_hbm [thread:$0]  (%p1863_p5), %s1479_s16, 256, %s1481_s26, %s1465_s0  }
 0x5ea PF: > { %p1605_p4 = scmp.ge.s32.totalorder %s1724_s21, 2  ;;  %s1492_s25 = sand.u32 1, %s1712_s18  }
 0x5eb   : > { %s1493_s27 = scalar_lea.sflag [#allocation3], %s1492_s25 }
 0x5ec   : > { %p1602_p7 = pnand %p1605_p4, %p1867_p6 }
 0x5ee   : > { %p1603_p8 = pneg %p1602_p7 }
 0x5f0   : > { %1707 = dma.done.wait (%p1603_p8), %s1493_s27, 256  }
 0x5f1   : > { %1709 = vsyncadd (%p1603_p8), %s1493_s27, 4294967040  ;;  %s2454_s21 = sld [smem:[#allocation6_spill]]  ;;  %s2457_s18 = smov %s1716_s19 }
 0x5f2   : > { %s2455_s1 = sld [smem:[#allocation5_spill]] }
 0x5f3   : > { %s2456_s20 = sld [smem:[#allocation7_spill]] }
 0x5f7   : > { %p25_p9 = scmp.ge.s32.totalorder %s2454_s21, 4  }
 0x5f8   : > { %s2458_s19 = smov %s2455_s1 }
 0x5f9   :  { %27 = sbr.rel (!%p25_p9) target bundleno = 7 (0x7), region = 115 }
 0x5fe   :  { %1499 = vsyncpa [#allocation3], 1 }
 0x5ff   :  { %1501 = vsyncpa [#allocation3 + $0x1], 1 }

</bundles_post_ra>
